<compile_context>
chip_gen: v6e
topology: v6e:2x2x1
jax: 0.10.0
libtpu: 0.0.40
codegen_flags: <defaults>
</compile_context>

<pallas_src>
import functools

import jax
import jax.numpy as jnp
from jax import lax
from jax.experimental import pallas as pl
from jax.experimental.pallas import tpu as pltpu


def _round_up(x, m):
    return (x + m - 1) // m * m


def _vmem_limit_bytes():
    """Chip-aware VMEM request: headroom on v7x, generous on v5e/v6e."""
    try:
        cap = int(pltpu.get_tpu_info().vmem_capacity_bytes)
    except Exception:
        cap = 64 * 1024 * 1024          # conservative fallback (v7x-sized)
    # leave ~16 MiB for compiler-internal scratch / DMA buffers; never ask
    # for more than ~100 MiB even on 128 MiB parts.
    return int(min(max(cap - 16 * 1024 * 1024, 32 * 1024 * 1024),
                   100 * 1024 * 1024))


# ------------------------------- Pallas kernel --------------------------------
def gru_chunk_kernel(pre_ref, wzr_ref, wh_ref, o_ref, h_ref, *, tt, hp):
    """Process TT timesteps of one GRU layer for one batch block.

    Grid = (batch_blocks [parallel], time_chunks [arbitrary/sequential]).
      pre_ref : (TT, Bb, 3*Hp)  precomputed x-side pre-activations [z|r|h~]
      wzr_ref : (Hp, 2*Hp)      fused recurrent weights for z|r
      wh_ref  : (Hp, Hp)        recurrent weights for h~
      o_ref   : (TT, Bb, Hp)    per-step hidden states (output)
      h_ref   : (Bb, Hp)        hidden state carried across time chunks (scratch)
    """
    tc = pl.program_id(1)

    @pl.when(tc == 0)
    def _():
        h_ref[...] = jnp.zeros_like(h_ref)

    def step(s, h):
        pre = pre_ref[s]                    # (Bb, 3*Hp)
        pre_zr = pre[:, : 2 * hp]
        pre_h = pre[:, 2 * hp:]
        # Weights are intentionally loaded from VMEM inside the loop (vld
        # slots are plentiful); hoisting them to vregs exceeds the 64-vreg
        # file across the unrolled body and forces spills.
        zr = jax.nn.sigmoid(
            pre_zr + jnp.dot(h, wzr_ref[...],
                             preferred_element_type=jnp.float32))
        z = zr[:, :hp]
        r = zr[:, hp:]
        h_tmp = jnp.tanh(
            pre_h + jnp.dot(z * h, wh_ref[...],
                            preferred_element_type=jnp.float32))
        h_new = h_tmp + r * (h - h_tmp)     # == r*h + (1-r)*h_tmp, one op fewer
        o_ref[s] = h_new
        return h_new

    # Bounded unroll: keeps vreg pressure / code size sane at large TT while
    # still giving the LLO scheduler multi-step visibility.
    h_ref[...] = lax.fori_loop(0, tt, step, h_ref[...], unroll=8)


# ------------------------------ layer wrapper ----------------------------------
def gru_layer_pallas(x_tm, wx3, b3, whh_zr, whh_h, *, tt, b_blk, vmem_limit):
    """Run one GRU layer over a padded, time-major sequence.

    x_tm : (Tp, Bp, Dx) f32   padded, time-major layer input
    wx3  : (Dx, 3*Hp)         fused x-side weights  (b3: (3*Hp,))
    whh_zr : (Hp, 2*Hp)       fused recurrent weights for z|r
    whh_h  : (Hp, Hp)         recurrent weights for h~
    returns (Tp, Bp, Hp) f32  per-step hidden states (padded lanes are 0)
    """
    Tp, Bp, _ = x_tm.shape
    Hp = whh_h.shape[1]

    # Hoisted x-side projection: one big parallel matmul over the whole seq.
    # Precision.HIGH (bf16_3x) keeps ~f32 accuracy at ~2x the speed of HIGHEST.
    # TODO(synk): fuse this projection into the kernel per chunk to avoid the
    # HBM round-trip of `pre` once sequence lengths / hidden sizes grow.
    pre = jnp.einsum('tbd,dh->tbh', x_tm, wx3,
                     precision=jax.lax.Precision.HIGH) + b3   # (Tp, Bp, 3Hp)

    nb = Bp // b_blk
    nt = Tp // tt

    kernel = functools.partial(gru_chunk_kernel, tt=tt, hp=Hp)
    out = pl.pallas_call(
        kernel,
        out_shape=jax.ShapeDtypeStruct((Tp, Bp, Hp), jnp.float32),
        grid_spec=pltpu.PrefetchScalarGridSpec(
            num_scalar_prefetch=0,
            grid=(nb, nt),
            in_specs=[
                pl.BlockSpec((tt, b_blk, 3 * Hp), lambda b, t: (t, b, 0)),
                pl.BlockSpec((Hp, 2 * Hp), lambda b, t: (0, 0)),
                pl.BlockSpec((Hp, Hp), lambda b, t: (0, 0)),
            ],
            out_specs=pl.BlockSpec((tt, b_blk, Hp), lambda b, t: (t, b, 0)),
            scratch_shapes=[pltpu.VMEM((b_blk, Hp), jnp.float32)],
        ),
        compiler_params=pltpu.CompilerParams(
            dimension_semantics=("parallel", "arbitrary"),   # batch ||, time seq
            vmem_limit_bytes=vmem_limit,
        ),
    )(pre, whh_zr, whh_h)
    return out


# --------------------------- weight preparation --------------------------------
def prep_layer_params(w_zr, b_zr, w_h, b_h, d_in, h, hp, x_width):
    """Split the 'concat-then-linear' weights, fuse and zero-pad to Hp lanes."""
    wz_x, wz_h = w_zr[:d_in, :h], w_zr[d_in:, :h]
    wr_x, wr_h = w_zr[:d_in, h:], w_zr[d_in:, h:]
    wh_x, wh_h = w_h[:d_in, :], w_h[d_in:, :]
    bz, br, bh = b_zr[:h], b_zr[h:], b_h

    pc = lambda w: jnp.pad(w, ((0, 0), (0, hp - h)))           # pad out columns
    pr = lambda w: jnp.pad(w, ((0, hp - h), (0, 0)))           # pad hidden rows
    px = lambda w: jnp.pad(w, ((0, x_width - d_in), (0, 0)))   # pad input rows
    pb = lambda v: jnp.pad(v, (0, hp - h))

    wx3 = jnp.concatenate([px(pc(wz_x)), px(pc(wr_x)), px(pc(wh_x))], axis=1)
    b3 = jnp.concatenate([pb(bz), pb(br), pb(bh)])
    whh_zr = jnp.concatenate([pr(pc(wz_h)), pr(pc(wr_h))], axis=1)
    whh_h = pr(pc(wh_h))
    f32 = jnp.float32
    return wx3.astype(f32), b3.astype(f32), whh_zr.astype(f32), whh_h.astype(f32)


# ------------------------------ TRNN forward -----------------------------------
def trnn_forward(x, layer_params, *, max_tt=64):
    """TRNN.forward: stacked GRU layers; returns stacked per-step hidden states."""
    B, T, d_in = x.shape

    # ---- batch padding / blocking.  Whenever Bp >= 16, force >= 2 batch
    # blocks so the "parallel" grid axis can shard across the 2 TensorCores
    # of a v7x chip (single block would leave one core idle).
    Bp = _round_up(B, 8)
    if Bp >= 16:
        Bp = _round_up(Bp, 16)
        b_blk = min(Bp // 2, 128)
        Bp = _round_up(Bp, b_blk)
    else:
        b_blk = Bp

    # ---- time chunking: as large as the VMEM budget allows (amortize the
    # per-grid-step pipeline overhead), capped by max_tt and the sequence.
    vmem_limit = _vmem_limit_bytes()
    hp_max = max(_round_up(p[3].shape[0], 128) for p in layer_params)
    weight_bytes = hp_max * (3 * hp_max) * 4            # whh_zr + whh_h (f32)
    stream_per_step = 2 * b_blk * (4 * hp_max) * 4      # (pre 3Hp + out Hp), x2 buffers
    budget = vmem_limit - weight_bytes - 8 * 1024 * 1024
    tt_cap = max(1, budget // max(stream_per_step, 1))
    tt = int(max(1, min(T, max_tt, tt_cap)))
    Tp = _round_up(T, tt)

    # Time-major + padding, exactly once at the edges.
    x_tm = jnp.transpose(x, (1, 0, 2))
    x_tm = jnp.pad(x_tm, ((0, Tp - T), (0, Bp - B), (0, 0)))

    cur, d_prev, h_last = x_tm, d_in, d_in
    for (w_zr, b_zr, w_h, b_h) in layer_params:
        h = b_h.shape[0]
        hp = _round_up(h, 128)
        wx3, b3, whh_zr, whh_h = prep_layer_params(
            w_zr, b_zr, w_h, b_h, d_prev, h, hp, cur.shape[-1])
        cur = gru_layer_pallas(cur, wx3, b3, whh_zr, whh_h,
                               tt=tt, b_blk=b_blk, vmem_limit=vmem_limit)
        d_prev, h_last = h, h

    out = cur[:T, :B, :h_last]
    return jnp.transpose(out, (1, 0, 2))          # back to (B, T, H)


# ---------------- pure-JAX reference (mirrors the PyTorch code) ----------------
def gru_layer_ref(x, w_zr, b_zr, w_h, b_h):
    B, T, _ = x.shape
    H = b_h.shape[0]
    hi = jax.lax.Precision.HIGHEST
    h = jnp.zeros((B, H), jnp.float32)
    outs = []
    for t in range(T):
        xt = x[:, t, :]
        zr = jax.nn.sigmoid(
            jnp.dot(jnp.concatenate([xt, h], -1), w_zr, precision=hi) + b_zr)
        z, r = zr[:, :H], zr[:, H:]
        h_tmp = jnp.tanh(
            jnp.dot(jnp.concatenate([xt, z * h], -1), w_h, precision=hi) + b_h)
        h = r * h + (1.0 - r) * h_tmp
        outs.append(h)
    return jnp.stack(outs, axis=1)


def trnn_ref(x, layer_params):
    cur = x
    for (w_zr, b_zr, w_h, b_h) in layer_params:
        cur = gru_layer_ref(cur, w_zr, b_zr, w_h, b_h)
    return cur


# ----------------------------- parameter init ----------------------------------
def init_trnn_params(key, dim_in, dim_out, num_layers):
    dim_list = [dim_in] + [dim_out] * num_layers
    params = []
    for layer in range(num_layers):
        d_in, d_out = dim_list[layer], dim_list[layer + 1]
        k1, k2, k3, k4, key = jax.random.split(key, 5)
        fan_in = d_in + d_out
        bound = 1.0 / jnp.sqrt(fan_in)
        w_zr = jax.random.uniform(k1, (fan_in, 2 * d_out), jnp.float32, -bound, bound)
        b_zr = jax.random.uniform(k2, (2 * d_out,), jnp.float32, -bound, bound)
        w_h = jax.random.uniform(k3, (fan_in, d_out), jnp.float32, -bound, bound)
        b_h = jax.random.uniform(k4, (d_out,), jnp.float32, -bound, bound)
        params.append((w_zr, b_zr, w_h, b_h))
    return params


if __name__ == "__main__":
    # Small shapes consistent with the module.
    batch, seq_len, dim_in, dim_out, num_layers = 2, 8, 4, 32, 2

    key = jax.random.PRNGKey(0)
    kx, kp = jax.random.split(key)
    x = jax.random.normal(kx, (batch, seq_len, dim_in), jnp.float32)
    layer_params = init_trnn_params(kp, dim_in, dim_out, num_layers)

    out = jax.jit(trnn_forward)(x, layer_params)
    out = jax.block_until_ready(out)

    ref = trnn_ref(x, layer_params)
    assert out.shape == (batch, seq_len, dim_out), out.shape
    max_err = float(jnp.max(jnp.abs(out - ref)))
    assert jnp.allclose(out, ref, atol=1e-4, rtol=1e-4), max_err

    print("KERNEL_OK")
</pallas_src>

<mosaic_0001>
module attributes {stable_mosaic.version = 11 : i64} {
  func.func @gru_chunk_kernel(%arg0: i32, %arg1: i32, %arg2: memref<8x8x384xf32, #tpu.memory_space<vmem>>, %arg3: memref<128x256xf32, #tpu.memory_space<vmem>>, %arg4: memref<128x128xf32, #tpu.memory_space<vmem>>, %arg5: memref<8x8x128xf32, #tpu.memory_space<vmem>>, %arg6: memref<8x128xf32, #tpu.memory_space<vmem>>) attributes {dimension_semantics = [#tpu.dimension_semantics<parallel>, #tpu.dimension_semantics<arbitrary>], iteration_bounds = array<i64: 1, 1>, scalar_prefetch = 0 : i64, scratch_operands = 1 : i64, tpu.core_type = #tpu.core_type<tc>, window_params = [{transform_indices = @transform_0, window_bounds = array<i64: 8, 8, 384>}, {pipeline_mode = #tpu.pipeline_mode<synchronous>, transform_indices = @transform_1, window_bounds = array<i64: 128, 256>}, {pipeline_mode = #tpu.pipeline_mode<synchronous>, transform_indices = @transform_2, window_bounds = array<i64: 128, 128>}, {transform_indices = @transform_3, window_bounds = array<i64: 8, 8, 128>}]} {
    %c0_i32 = arith.constant 0 : i32
    %0 = arith.cmpi eq, %arg1, %c0_i32 : i32
    %1 = arith.extui %0 : i1 to i32
    %c0_i32_0 = arith.constant 0 : i32
    %2 = arith.cmpi ne, %1, %c0_i32_0 : i32
    scf.if %2 {
      %cst_92 = arith.constant 0.000000e+00 : f32
      %221 = vector.broadcast %cst_92 : f32 to vector<8x128xf32>
      %c0_93 = arith.constant 0 : index
      %c0_94 = arith.constant 0 : index
      %222 = vector.load %arg6[%c0_93, %c0_94] : memref<8x128xf32, #tpu.memory_space<vmem>>, vector<8x128xf32>
      tpu.vector_store %arg6[%c0_93, %c0_94], %221 {strides = array<i32>} : memref<8x128xf32, #tpu.memory_space<vmem>>, vector<8x128xf32>,
    } else {
    }
    %c0 = arith.constant 0 : index
    %c0_1 = arith.constant 0 : index
    %3 = vector.load %arg6[%c0, %c0_1] : memref<8x128xf32, #tpu.memory_space<vmem>>, vector<8x128xf32>
    %c0_i32_2 = arith.constant 0 : i32
    %4 = arith.index_cast %c0_i32_2 : i32 to index
    %c0_3 = arith.constant 0 : index
    %c0_4 = arith.constant 0 : index
    %5 = vector.load %arg2[%4, %c0_3, %c0_4] : memref<8x8x384xf32, #tpu.memory_space<vmem>>, vector<1x8x384xf32>
    %6 = vector.shape_cast %5 : vector<1x8x384xf32> to vector<8x384xf32>
    %7 = vector.extract_strided_slice %6 {offsets = [0, 0], sizes = [8, 256], strides = [1, 1]} : vector<8x384xf32> to vector<8x256xf32>
    %8 = vector.extract_strided_slice %6 {offsets = [0, 256], sizes = [8, 128], strides = [1, 1]} : vector<8x384xf32> to vector<8x128xf32>
    %c0_5 = arith.constant 0 : index
    %c0_6 = arith.constant 0 : index
    %9 = vector.load %arg3[%c0_5, %c0_6] : memref<128x256xf32, #tpu.memory_space<vmem>>, vector<128x256xf32>
    %cst = arith.constant dense<0.000000e+00> : vector<8x256xf32>
    %10 = tpu.matmul %3, %9, %cst {dimension_numbers = #tpu.dot_dimension_numbers<[1], [0], [0], [1], [0, 0, 1, 1], [], []>} : vector<8x128xf32>, vector<128x256xf32>, vector<8x256xf32> -> vector<8x256xf32>
    %11 = arith.addf %7, %10 : vector<8x256xf32>
    %12 = arith.negf %11 : vector<8x256xf32>
    %13 = math.exp %12 : vector<8x256xf32>
    %cst_7 = arith.constant 1.000000e+00 : f32
    %14 = vector.broadcast %cst_7 : f32 to vector<8x256xf32>
    %15 = arith.addf %14, %13 : vector<8x256xf32>
    %16 = arith.divf %14, %15 : vector<8x256xf32>
    %17 = vector.extract_strided_slice %16 {offsets = [0, 0], sizes = [8, 128], strides = [1, 1]} : vector<8x256xf32> to vector<8x128xf32>
    %18 = vector.extract_strided_slice %16 {offsets = [0, 128], sizes = [8, 128], strides = [1, 1]} : vector<8x256xf32> to vector<8x128xf32>
    %19 = arith.mulf %17, %3 : vector<8x128xf32>
    %c0_8 = arith.constant 0 : index
    %c0_9 = arith.constant 0 : index
    %20 = vector.load %arg4[%c0_8, %c0_9] : memref<128x128xf32, #tpu.memory_space<vmem>>, vector<128x128xf32>
    %cst_10 = arith.constant dense<0.000000e+00> : vector<8x128xf32>
    %21 = tpu.matmul %19, %20, %cst_10 {dimension_numbers = #tpu.dot_dimension_numbers<[1], [0], [0], [1], [0, 0, 1, 1], [], []>} : vector<8x128xf32>, vector<128x128xf32>, vector<8x128xf32> -> vector<8x128xf32>
    %22 = arith.addf %8, %21 : vector<8x128xf32>
    %23 = math.tanh %22 : vector<8x128xf32>
    %24 = arith.subf %3, %23 : vector<8x128xf32>
    %25 = arith.mulf %18, %24 : vector<8x128xf32>
    %26 = arith.addf %23, %25 : vector<8x128xf32>
    %27 = arith.index_cast %c0_i32_2 : i32 to index
    %c0_11 = arith.constant 0 : index
    %c0_12 = arith.constant 0 : index
    %28 = vector.load %arg5[%27, %c0_11, %c0_12] : memref<8x8x128xf32, #tpu.memory_space<vmem>>, vector<1x8x128xf32>
    %29 = vector.shape_cast %28 : vector<1x8x128xf32> to vector<8x128xf32>
    %30 = vector.shape_cast %26 : vector<8x128xf32> to vector<1x8x128xf32>
    tpu.vector_store %arg5[%27, %c0_11, %c0_12], %30 {strides = array<i32>} : memref<8x8x128xf32, #tpu.memory_space<vmem>>, vector<1x8x128xf32>,
    %c1_i32 = arith.constant 1 : i32
    %31 = arith.index_cast %c1_i32 : i32 to index
    %c0_13 = arith.constant 0 : index
    %c0_14 = arith.constant 0 : index
    %32 = vector.load %arg2[%31, %c0_13, %c0_14] : memref<8x8x384xf32, #tpu.memory_space<vmem>>, vector<1x8x384xf32>
    %33 = vector.shape_cast %32 : vector<1x8x384xf32> to vector<8x384xf32>
    %34 = vector.extract_strided_slice %33 {offsets = [0, 0], sizes = [8, 256], strides = [1, 1]} : vector<8x384xf32> to vector<8x256xf32>
    %35 = vector.extract_strided_slice %33 {offsets = [0, 256], sizes = [8, 128], strides = [1, 1]} : vector<8x384xf32> to vector<8x128xf32>
    %c0_15 = arith.constant 0 : index
    %c0_16 = arith.constant 0 : index
    %36 = vector.load %arg3[%c0_15, %c0_16] : memref<128x256xf32, #tpu.memory_space<vmem>>, vector<128x256xf32>
    %cst_17 = arith.constant dense<0.000000e+00> : vector<8x256xf32>
    %37 = tpu.matmul %26, %36, %cst_17 {dimension_numbers = #tpu.dot_dimension_numbers<[1], [0], [0], [1], [0, 0, 1, 1], [], []>} : vector<8x128xf32>, vector<128x256xf32>, vector<8x256xf32> -> vector<8x256xf32>
    %38 = arith.addf %34, %37 : vector<8x256xf32>
    %39 = arith.negf %38 : vector<8x256xf32>
    %40 = math.exp %39 : vector<8x256xf32>
    %cst_18 = arith.constant 1.000000e+00 : f32
    %41 = vector.broadcast %cst_18 : f32 to vector<8x256xf32>
    %42 = arith.addf %41, %40 : vector<8x256xf32>
    %43 = arith.divf %41, %42 : vector<8x256xf32>
    %44 = vector.extract_strided_slice %43 {offsets = [0, 0], sizes = [8, 128], strides = [1, 1]} : vector<8x256xf32> to vector<8x128xf32>
    %45 = vector.extract_strided_slice %43 {offsets = [0, 128], sizes = [8, 128], strides = [1, 1]} : vector<8x256xf32> to vector<8x128xf32>
    %46 = arith.mulf %44, %26 : vector<8x128xf32>
    %c0_19 = arith.constant 0 : index
    %c0_20 = arith.constant 0 : index
    %47 = vector.load %arg4[%c0_19, %c0_20] : memref<128x128xf32, #tpu.memory_space<vmem>>, vector<128x128xf32>
    %cst_21 = arith.constant dense<0.000000e+00> : vector<8x128xf32>
    %48 = tpu.matmul %46, %47, %cst_21 {dimension_numbers = #tpu.dot_dimension_numbers<[1], [0], [0], [1], [0, 0, 1, 1], [], []>} : vector<8x128xf32>, vector<128x128xf32>, vector<8x128xf32> -> vector<8x128xf32>
    %49 = arith.addf %35, %48 : vector<8x128xf32>
    %50 = math.tanh %49 : vector<8x128xf32>
    %51 = arith.subf %26, %50 : vector<8x128xf32>
    %52 = arith.mulf %45, %51 : vector<8x128xf32>
    %53 = arith.addf %50, %52 : vector<8x128xf32>
    %54 = arith.index_cast %c1_i32 : i32 to index
    %c0_22 = arith.constant 0 : index
    %c0_23 = arith.constant 0 : index
    %55 = vector.load %arg5[%54, %c0_22, %c0_23] : memref<8x8x128xf32, #tpu.memory_space<vmem>>, vector<1x8x128xf32>
    %56 = vector.shape_cast %55 : vector<1x8x128xf32> to vector<8x128xf32>
    %57 = vector.shape_cast %53 : vector<8x128xf32> to vector<1x8x128xf32>
    tpu.vector_store %arg5[%54, %c0_22, %c0_23], %57 {strides = array<i32>} : memref<8x8x128xf32, #tpu.memory_space<vmem>>, vector<1x8x128xf32>,
    %c2_i32 = arith.constant 2 : i32
    %58 = arith.index_cast %c2_i32 : i32 to index
    %c0_24 = arith.constant 0 : index
    %c0_25 = arith.constant 0 : index
    %59 = vector.load %arg2[%58, %c0_24, %c0_25] : memref<8x8x384xf32, #tpu.memory_space<vmem>>, vector<1x8x384xf32>
    %60 = vector.shape_cast %59 : vector<1x8x384xf32> to vector<8x384xf32>
    %61 = vector.extract_strided_slice %60 {offsets = [0, 0], sizes = [8, 256], strides = [1, 1]} : vector<8x384xf32> to vector<8x256xf32>
    %62 = vector.extract_strided_slice %60 {offsets = [0, 256], sizes = [8, 128], strides = [1, 1]} : vector<8x384xf32> to vector<8x128xf32>
    %c0_26 = arith.constant 0 : index
    %c0_27 = arith.constant 0 : index
    %63 = vector.load %arg3[%c0_26, %c0_27] : memref<128x256xf32, #tpu.memory_space<vmem>>, vector<128x256xf32>
    %cst_28 = arith.constant dense<0.000000e+00> : vector<8x256xf32>
    %64 = tpu.matmul %53, %63, %cst_28 {dimension_numbers = #tpu.dot_dimension_numbers<[1], [0], [0], [1], [0, 0, 1, 1], [], []>} : vector<8x128xf32>, vector<128x256xf32>, vector<8x256xf32> -> vector<8x256xf32>
    %65 = arith.addf %61, %64 : vector<8x256xf32>
    %66 = arith.negf %65 : vector<8x256xf32>
    %67 = math.exp %66 : vector<8x256xf32>
    %cst_29 = arith.constant 1.000000e+00 : f32
    %68 = vector.broadcast %cst_29 : f32 to vector<8x256xf32>
    %69 = arith.addf %68, %67 : vector<8x256xf32>
    %70 = arith.divf %68, %69 : vector<8x256xf32>
    %71 = vector.extract_strided_slice %70 {offsets = [0, 0], sizes = [8, 128], strides = [1, 1]} : vector<8x256xf32> to vector<8x128xf32>
    %72 = vector.extract_strided_slice %70 {offsets = [0, 128], sizes = [8, 128], strides = [1, 1]} : vector<8x256xf32> to vector<8x128xf32>
    %73 = arith.mulf %71, %53 : vector<8x128xf32>
    %c0_30 = arith.constant 0 : index
    %c0_31 = arith.constant 0 : index
    %74 = vector.load %arg4[%c0_30, %c0_31] : memref<128x128xf32, #tpu.memory_space<vmem>>, vector<128x128xf32>
    %cst_32 = arith.constant dense<0.000000e+00> : vector<8x128xf32>
    %75 = tpu.matmul %73, %74, %cst_32 {dimension_numbers = #tpu.dot_dimension_numbers<[1], [0], [0], [1], [0, 0, 1, 1], [], []>} : vector<8x128xf32>, vector<128x128xf32>, vector<8x128xf32> -> vector<8x128xf32>
    %76 = arith.addf %62, %75 : vector<8x128xf32>
    %77 = math.tanh %76 : vector<8x128xf32>
    %78 = arith.subf %53, %77 : vector<8x128xf32>
    %79 = arith.mulf %72, %78 : vector<8x128xf32>
    %80 = arith.addf %77, %79 : vector<8x128xf32>
    %81 = arith.index_cast %c2_i32 : i32 to index
    %c0_33 = arith.constant 0 : index
    %c0_34 = arith.constant 0 : index
    %82 = vector.load %arg5[%81, %c0_33, %c0_34] : memref<8x8x128xf32, #tpu.memory_space<vmem>>, vector<1x8x128xf32>
    %83 = vector.shape_cast %82 : vector<1x8x128xf32> to vector<8x128xf32>
    %84 = vector.shape_cast %80 : vector<8x128xf32> to vector<1x8x128xf32>
    tpu.vector_store %arg5[%81, %c0_33, %c0_34], %84 {strides = array<i32>} : memref<8x8x128xf32, #tpu.memory_space<vmem>>, vector<1x8x128xf32>,
    %c3_i32 = arith.constant 3 : i32
    %85 = arith.index_cast %c3_i32 : i32 to index
    %c0_35 = arith.constant 0 : index
    %c0_36 = arith.constant 0 : index
    %86 = vector.load %arg2[%85, %c0_35, %c0_36] : memref<8x8x384xf32, #tpu.memory_space<vmem>>, vector<1x8x384xf32>
    %87 = vector.shape_cast %86 : vector<1x8x384xf32> to vector<8x384xf32>
    %88 = vector.extract_strided_slice %87 {offsets = [0, 0], sizes = [8, 256], strides = [1, 1]} : vector<8x384xf32> to vector<8x256xf32>
    %89 = vector.extract_strided_slice %87 {offsets = [0, 256], sizes = [8, 128], strides = [1, 1]} : vector<8x384xf32> to vector<8x128xf32>
    %c0_37 = arith.constant 0 : index
    %c0_38 = arith.constant 0 : index
    %90 = vector.load %arg3[%c0_37, %c0_38] : memref<128x256xf32, #tpu.memory_space<vmem>>, vector<128x256xf32>
    %cst_39 = arith.constant dense<0.000000e+00> : vector<8x256xf32>
    %91 = tpu.matmul %80, %90, %cst_39 {dimension_numbers = #tpu.dot_dimension_numbers<[1], [0], [0], [1], [0, 0, 1, 1], [], []>} : vector<8x128xf32>, vector<128x256xf32>, vector<8x256xf32> -> vector<8x256xf32>
    %92 = arith.addf %88, %91 : vector<8x256xf32>
    %93 = arith.negf %92 : vector<8x256xf32>
    %94 = math.exp %93 : vector<8x256xf32>
    %cst_40 = arith.constant 1.000000e+00 : f32
    %95 = vector.broadcast %cst_40 : f32 to vector<8x256xf32>
    %96 = arith.addf %95, %94 : vector<8x256xf32>
    %97 = arith.divf %95, %96 : vector<8x256xf32>
    %98 = vector.extract_strided_slice %97 {offsets = [0, 0], sizes = [8, 128], strides = [1, 1]} : vector<8x256xf32> to vector<8x128xf32>
    %99 = vector.extract_strided_slice %97 {offsets = [0, 128], sizes = [8, 128], strides = [1, 1]} : vector<8x256xf32> to vector<8x128xf32>
    %100 = arith.mulf %98, %80 : vector<8x128xf32>
    %c0_41 = arith.constant 0 : index
    %c0_42 = arith.constant 0 : index
    %101 = vector.load %arg4[%c0_41, %c0_42] : memref<128x128xf32, #tpu.memory_space<vmem>>, vector<128x128xf32>
    %cst_43 = arith.constant dense<0.000000e+00> : vector<8x128xf32>
    %102 = tpu.matmul %100, %101, %cst_43 {dimension_numbers = #tpu.dot_dimension_numbers<[1], [0], [0], [1], [0, 0, 1, 1], [], []>} : vector<8x128xf32>, vector<128x128xf32>, vector<8x128xf32> -> vector<8x128xf32>
    %103 = arith.addf %89, %102 : vector<8x128xf32>
    %104 = math.tanh %103 : vector<8x128xf32>
    %105 = arith.subf %80, %104 : vector<8x128xf32>
    %106 = arith.mulf %99, %105 : vector<8x128xf32>
    %107 = arith.addf %104, %106 : vector<8x128xf32>
    %108 = arith.index_cast %c3_i32 : i32 to index
    %c0_44 = arith.constant 0 : index
    %c0_45 = arith.constant 0 : index
    %109 = vector.load %arg5[%108, %c0_44, %c0_45] : memref<8x8x128xf32, #tpu.memory_space<vmem>>, vector<1x8x128xf32>
    %110 = vector.shape_cast %109 : vector<1x8x128xf32> to vector<8x128xf32>
    %111 = vector.shape_cast %107 : vector<8x128xf32> to vector<1x8x128xf32>
    tpu.vector_store %arg5[%108, %c0_44, %c0_45], %111 {strides = array<i32>} : memref<8x8x128xf32, #tpu.memory_space<vmem>>, vector<1x8x128xf32>,
    %c4_i32 = arith.constant 4 : i32
    %112 = arith.index_cast %c4_i32 : i32 to index
    %c0_46 = arith.constant 0 : index
    %c0_47 = arith.constant 0 : index
    %113 = vector.load %arg2[%112, %c0_46, %c0_47] : memref<8x8x384xf32, #tpu.memory_space<vmem>>, vector<1x8x384xf32>
    %114 = vector.shape_cast %113 : vector<1x8x384xf32> to vector<8x384xf32>
    %115 = vector.extract_strided_slice %114 {offsets = [0, 0], sizes = [8, 256], strides = [1, 1]} : vector<8x384xf32> to vector<8x256xf32>
    %116 = vector.extract_strided_slice %114 {offsets = [0, 256], sizes = [8, 128], strides = [1, 1]} : vector<8x384xf32> to vector<8x128xf32>
    %c0_48 = arith.constant 0 : index
    %c0_49 = arith.constant 0 : index
    %117 = vector.load %arg3[%c0_48, %c0_49] : memref<128x256xf32, #tpu.memory_space<vmem>>, vector<128x256xf32>
    %cst_50 = arith.constant dense<0.000000e+00> : vector<8x256xf32>
    %118 = tpu.matmul %107, %117, %cst_50 {dimension_numbers = #tpu.dot_dimension_numbers<[1], [0], [0], [1], [0, 0, 1, 1], [], []>} : vector<8x128xf32>, vector<128x256xf32>, vector<8x256xf32> -> vector<8x256xf32>
    %119 = arith.addf %115, %118 : vector<8x256xf32>
    %120 = arith.negf %119 : vector<8x256xf32>
    %121 = math.exp %120 : vector<8x256xf32>
    %cst_51 = arith.constant 1.000000e+00 : f32
    %122 = vector.broadcast %cst_51 : f32 to vector<8x256xf32>
    %123 = arith.addf %122, %121 : vector<8x256xf32>
    %124 = arith.divf %122, %123 : vector<8x256xf32>
    %125 = vector.extract_strided_slice %124 {offsets = [0, 0], sizes = [8, 128], strides = [1, 1]} : vector<8x256xf32> to vector<8x128xf32>
    %126 = vector.extract_strided_slice %124 {offsets = [0, 128], sizes = [8, 128], strides = [1, 1]} : vector<8x256xf32> to vector<8x128xf32>
    %127 = arith.mulf %125, %107 : vector<8x128xf32>
    %c0_52 = arith.constant 0 : index
    %c0_53 = arith.constant 0 : index
    %128 = vector.load %arg4[%c0_52, %c0_53] : memref<128x128xf32, #tpu.memory_space<vmem>>, vector<128x128xf32>
    %cst_54 = arith.constant dense<0.000000e+00> : vector<8x128xf32>
    %129 = tpu.matmul %127, %128, %cst_54 {dimension_numbers = #tpu.dot_dimension_numbers<[1], [0], [0], [1], [0, 0, 1, 1], [], []>} : vector<8x128xf32>, vector<128x128xf32>, vector<8x128xf32> -> vector<8x128xf32>
    %130 = arith.addf %116, %129 : vector<8x128xf32>
    %131 = math.tanh %130 : vector<8x128xf32>
    %132 = arith.subf %107, %131 : vector<8x128xf32>
    %133 = arith.mulf %126, %132 : vector<8x128xf32>
    %134 = arith.addf %131, %133 : vector<8x128xf32>
    %135 = arith.index_cast %c4_i32 : i32 to index
    %c0_55 = arith.constant 0 : index
    %c0_56 = arith.constant 0 : index
    %136 = vector.load %arg5[%135, %c0_55, %c0_56] : memref<8x8x128xf32, #tpu.memory_space<vmem>>, vector<1x8x128xf32>
    %137 = vector.shape_cast %136 : vector<1x8x128xf32> to vector<8x128xf32>
    %138 = vector.shape_cast %134 : vector<8x128xf32> to vector<1x8x128xf32>
    tpu.vector_store %arg5[%135, %c0_55, %c0_56], %138 {strides = array<i32>} : memref<8x8x128xf32, #tpu.memory_space<vmem>>, vector<1x8x128xf32>,
    %c5_i32 = arith.constant 5 : i32
    %139 = arith.index_cast %c5_i32 : i32 to index
    %c0_57 = arith.constant 0 : index
    %c0_58 = arith.constant 0 : index
    %140 = vector.load %arg2[%139, %c0_57, %c0_58] : memref<8x8x384xf32, #tpu.memory_space<vmem>>, vector<1x8x384xf32>
    %141 = vector.shape_cast %140 : vector<1x8x384xf32> to vector<8x384xf32>
    %142 = vector.extract_strided_slice %141 {offsets = [0, 0], sizes = [8, 256], strides = [1, 1]} : vector<8x384xf32> to vector<8x256xf32>
    %143 = vector.extract_strided_slice %141 {offsets = [0, 256], sizes = [8, 128], strides = [1, 1]} : vector<8x384xf32> to vector<8x128xf32>
    %c0_59 = arith.constant 0 : index
    %c0_60 = arith.constant 0 : index
    %144 = vector.load %arg3[%c0_59, %c0_60] : memref<128x256xf32, #tpu.memory_space<vmem>>, vector<128x256xf32>
    %cst_61 = arith.constant dense<0.000000e+00> : vector<8x256xf32>
    %145 = tpu.matmul %134, %144, %cst_61 {dimension_numbers = #tpu.dot_dimension_numbers<[1], [0], [0], [1], [0, 0, 1, 1], [], []>} : vector<8x128xf32>, vector<128x256xf32>, vector<8x256xf32> -> vector<8x256xf32>
    %146 = arith.addf %142, %145 : vector<8x256xf32>
    %147 = arith.negf %146 : vector<8x256xf32>
    %148 = math.exp %147 : vector<8x256xf32>
    %cst_62 = arith.constant 1.000000e+00 : f32
    %149 = vector.broadcast %cst_62 : f32 to vector<8x256xf32>
    %150 = arith.addf %149, %148 : vector<8x256xf32>
    %151 = arith.divf %149, %150 : vector<8x256xf32>
    %152 = vector.extract_strided_slice %151 {offsets = [0, 0], sizes = [8, 128], strides = [1, 1]} : vector<8x256xf32> to vector<8x128xf32>
    %153 = vector.extract_strided_slice %151 {offsets = [0, 128], sizes = [8, 128], strides = [1, 1]} : vector<8x256xf32> to vector<8x128xf32>
    %154 = arith.mulf %152, %134 : vector<8x128xf32>
    %c0_63 = arith.constant 0 : index
    %c0_64 = arith.constant 0 : index
    %155 = vector.load %arg4[%c0_63, %c0_64] : memref<128x128xf32, #tpu.memory_space<vmem>>, vector<128x128xf32>
    %cst_65 = arith.constant dense<0.000000e+00> : vector<8x128xf32>
    %156 = tpu.matmul %154, %155, %cst_65 {dimension_numbers = #tpu.dot_dimension_numbers<[1], [0], [0], [1], [0, 0, 1, 1], [], []>} : vector<8x128xf32>, vector<128x128xf32>, vector<8x128xf32> -> vector<8x128xf32>
    %157 = arith.addf %143, %156 : vector<8x128xf32>
    %158 = math.tanh %157 : vector<8x128xf32>
    %159 = arith.subf %134, %158 : vector<8x128xf32>
    %160 = arith.mulf %153, %159 : vector<8x128xf32>
    %161 = arith.addf %158, %160 : vector<8x128xf32>
    %162 = arith.index_cast %c5_i32 : i32 to index
    %c0_66 = arith.constant 0 : index
    %c0_67 = arith.constant 0 : index
    %163 = vector.load %arg5[%162, %c0_66, %c0_67] : memref<8x8x128xf32, #tpu.memory_space<vmem>>, vector<1x8x128xf32>
    %164 = vector.shape_cast %163 : vector<1x8x128xf32> to vector<8x128xf32>
    %165 = vector.shape_cast %161 : vector<8x128xf32> to vector<1x8x128xf32>
    tpu.vector_store %arg5[%162, %c0_66, %c0_67], %165 {strides = array<i32>} : memref<8x8x128xf32, #tpu.memory_space<vmem>>, vector<1x8x128xf32>,
    %c6_i32 = arith.constant 6 : i32
    %166 = arith.index_cast %c6_i32 : i32 to index
    %c0_68 = arith.constant 0 : index
    %c0_69 = arith.constant 0 : index
    %167 = vector.load %arg2[%166, %c0_68, %c0_69] : memref<8x8x384xf32, #tpu.memory_space<vmem>>, vector<1x8x384xf32>
    %168 = vector.shape_cast %167 : vector<1x8x384xf32> to vector<8x384xf32>
    %169 = vector.extract_strided_slice %168 {offsets = [0, 0], sizes = [8, 256], strides = [1, 1]} : vector<8x384xf32> to vector<8x256xf32>
    %170 = vector.extract_strided_slice %168 {offsets = [0, 256], sizes = [8, 128], strides = [1, 1]} : vector<8x384xf32> to vector<8x128xf32>
    %c0_70 = arith.constant 0 : index
    %c0_71 = arith.constant 0 : index
    %171 = vector.load %arg3[%c0_70, %c0_71] : memref<128x256xf32, #tpu.memory_space<vmem>>, vector<128x256xf32>
    %cst_72 = arith.constant dense<0.000000e+00> : vector<8x256xf32>
    %172 = tpu.matmul %161, %171, %cst_72 {dimension_numbers = #tpu.dot_dimension_numbers<[1], [0], [0], [1], [0, 0, 1, 1], [], []>} : vector<8x128xf32>, vector<128x256xf32>, vector<8x256xf32> -> vector<8x256xf32>
    %173 = arith.addf %169, %172 : vector<8x256xf32>
    %174 = arith.negf %173 : vector<8x256xf32>
    %175 = math.exp %174 : vector<8x256xf32>
    %cst_73 = arith.constant 1.000000e+00 : f32
    %176 = vector.broadcast %cst_73 : f32 to vector<8x256xf32>
    %177 = arith.addf %176, %175 : vector<8x256xf32>
    %178 = arith.divf %176, %177 : vector<8x256xf32>
    %179 = vector.extract_strided_slice %178 {offsets = [0, 0], sizes = [8, 128], strides = [1, 1]} : vector<8x256xf32> to vector<8x128xf32>
    %180 = vector.extract_strided_slice %178 {offsets = [0, 128], sizes = [8, 128], strides = [1, 1]} : vector<8x256xf32> to vector<8x128xf32>
    %181 = arith.mulf %179, %161 : vector<8x128xf32>
    %c0_74 = arith.constant 0 : index
    %c0_75 = arith.constant 0 : index
    %182 = vector.load %arg4[%c0_74, %c0_75] : memref<128x128xf32, #tpu.memory_space<vmem>>, vector<128x128xf32>
    %cst_76 = arith.constant dense<0.000000e+00> : vector<8x128xf32>
    %183 = tpu.matmul %181, %182, %cst_76 {dimension_numbers = #tpu.dot_dimension_numbers<[1], [0], [0], [1], [0, 0, 1, 1], [], []>} : vector<8x128xf32>, vector<128x128xf32>, vector<8x128xf32> -> vector<8x128xf32>
    %184 = arith.addf %170, %183 : vector<8x128xf32>
    %185 = math.tanh %184 : vector<8x128xf32>
    %186 = arith.subf %161, %185 : vector<8x128xf32>
    %187 = arith.mulf %180, %186 : vector<8x128xf32>
    %188 = arith.addf %185, %187 : vector<8x128xf32>
    %189 = arith.index_cast %c6_i32 : i32 to index
    %c0_77 = arith.constant 0 : index
    %c0_78 = arith.constant 0 : index
    %190 = vector.load %arg5[%189, %c0_77, %c0_78] : memref<8x8x128xf32, #tpu.memory_space<vmem>>, vector<1x8x128xf32>
    %191 = vector.shape_cast %190 : vector<1x8x128xf32> to vector<8x128xf32>
    %192 = vector.shape_cast %188 : vector<8x128xf32> to vector<1x8x128xf32>
    tpu.vector_store %arg5[%189, %c0_77, %c0_78], %192 {strides = array<i32>} : memref<8x8x128xf32, #tpu.memory_space<vmem>>, vector<1x8x128xf32>,
    %c7_i32 = arith.constant 7 : i32
    %193 = arith.index_cast %c7_i32 : i32 to index
    %c0_79 = arith.constant 0 : index
    %c0_80 = arith.constant 0 : index
    %194 = vector.load %arg2[%193, %c0_79, %c0_80] : memref<8x8x384xf32, #tpu.memory_space<vmem>>, vector<1x8x384xf32>
    %195 = vector.shape_cast %194 : vector<1x8x384xf32> to vector<8x384xf32>
    %196 = vector.extract_strided_slice %195 {offsets = [0, 0], sizes = [8, 256], strides = [1, 1]} : vector<8x384xf32> to vector<8x256xf32>
    %197 = vector.extract_strided_slice %195 {offsets = [0, 256], sizes = [8, 128], strides = [1, 1]} : vector<8x384xf32> to vector<8x128xf32>
    %c0_81 = arith.constant 0 : index
    %c0_82 = arith.constant 0 : index
    %198 = vector.load %arg3[%c0_81, %c0_82] : memref<128x256xf32, #tpu.memory_space<vmem>>, vector<128x256xf32>
    %cst_83 = arith.constant dense<0.000000e+00> : vector<8x256xf32>
    %199 = tpu.matmul %188, %198, %cst_83 {dimension_numbers = #tpu.dot_dimension_numbers<[1], [0], [0], [1], [0, 0, 1, 1], [], []>} : vector<8x128xf32>, vector<128x256xf32>, vector<8x256xf32> -> vector<8x256xf32>
    %200 = arith.addf %196, %199 : vector<8x256xf32>
    %201 = arith.negf %200 : vector<8x256xf32>
    %202 = math.exp %201 : vector<8x256xf32>
    %cst_84 = arith.constant 1.000000e+00 : f32
    %203 = vector.broadcast %cst_84 : f32 to vector<8x256xf32>
    %204 = arith.addf %203, %202 : vector<8x256xf32>
    %205 = arith.divf %203, %204 : vector<8x256xf32>
    %206 = vector.extract_strided_slice %205 {offsets = [0, 0], sizes = [8, 128], strides = [1, 1]} : vector<8x256xf32> to vector<8x128xf32>
    %207 = vector.extract_strided_slice %205 {offsets = [0, 128], sizes = [8, 128], strides = [1, 1]} : vector<8x256xf32> to vector<8x128xf32>
    %208 = arith.mulf %206, %188 : vector<8x128xf32>
    %c0_85 = arith.constant 0 : index
    %c0_86 = arith.constant 0 : index
    %209 = vector.load %arg4[%c0_85, %c0_86] : memref<128x128xf32, #tpu.memory_space<vmem>>, vector<128x128xf32>
    %cst_87 = arith.constant dense<0.000000e+00> : vector<8x128xf32>
    %210 = tpu.matmul %208, %209, %cst_87 {dimension_numbers = #tpu.dot_dimension_numbers<[1], [0], [0], [1], [0, 0, 1, 1], [], []>} : vector<8x128xf32>, vector<128x128xf32>, vector<8x128xf32> -> vector<8x128xf32>
    %211 = arith.addf %197, %210 : vector<8x128xf32>
    %212 = math.tanh %211 : vector<8x128xf32>
    %213 = arith.subf %188, %212 : vector<8x128xf32>
    %214 = arith.mulf %207, %213 : vector<8x128xf32>
    %215 = arith.addf %212, %214 : vector<8x128xf32>
    %216 = arith.index_cast %c7_i32 : i32 to index
    %c0_88 = arith.constant 0 : index
    %c0_89 = arith.constant 0 : index
    %217 = vector.load %arg5[%216, %c0_88, %c0_89] : memref<8x8x128xf32, #tpu.memory_space<vmem>>, vector<1x8x128xf32>
    %218 = vector.shape_cast %217 : vector<1x8x128xf32> to vector<8x128xf32>
    %219 = vector.shape_cast %215 : vector<8x128xf32> to vector<1x8x128xf32>
    tpu.vector_store %arg5[%216, %c0_88, %c0_89], %219 {strides = array<i32>} : memref<8x8x128xf32, #tpu.memory_space<vmem>>, vector<1x8x128xf32>,
    %c8_i32 = arith.constant 8 : i32
    %c0_90 = arith.constant 0 : index
    %c0_91 = arith.constant 0 : index
    %220 = vector.load %arg6[%c0_90, %c0_91] : memref<8x128xf32, #tpu.memory_space<vmem>>, vector<8x128xf32>
    tpu.vector_store %arg6[%c0_90, %c0_91], %215 {strides = array<i32>} : memref<8x128xf32, #tpu.memory_space<vmem>>, vector<8x128xf32>,
    return
  }
  func.func @transform_0(%arg0: i32, %arg1: i32) -> (i32, i32, i32) {
    %c0_i32 = arith.constant 0 : i32
    %c0_i32_0 = arith.constant 0 : i32
    return %arg1, %arg0, %c0_i32 : i32, i32, i32
  }
  func.func @transform_1(%arg0: i32, %arg1: i32) -> (i32, i32) {
    %c0_i32 = arith.constant 0 : i32
    %c0_i32_0 = arith.constant 0 : i32
    %c0_i32_1 = arith.constant 0 : i32
    return %c0_i32, %c0_i32_0 : i32, i32
  }
  func.func @transform_2(%arg0: i32, %arg1: i32) -> (i32, i32) {
    %c0_i32 = arith.constant 0 : i32
    %c0_i32_0 = arith.constant 0 : i32
    %c0_i32_1 = arith.constant 0 : i32
    return %c0_i32, %c0_i32_0 : i32, i32
  }
  func.func @transform_3(%arg0: i32, %arg1: i32) -> (i32, i32, i32) {
    %c0_i32 = arith.constant 0 : i32
    %c0_i32_0 = arith.constant 0 : i32
    return %arg1, %arg0, %c0_i32 : i32, i32, i32
  }
}

</mosaic_0001>

<bundles_post_ra>
// kernel: trnn_forward.2
= control target key start
LH: loop header
LB: loop body
LE: loop exit
PB: predicated region body
PF: predicated region fallthrough
CT: control target
= control target key end

     0   :  { %v3460_v3 = vmov 0.0   ;;  %vm2286_vm0 = vmmov 0   ;;  %s3456_s1 = inlined_call_operand.vmem [shape: f32[128,256], index: 1, kind: input, shape index: {}]   ;;  %s3457_s2 = inlined_call_operand.vmem [shape: f32[128,128], index: 2, kind: input, shape index: {}]   ;;  %s3458_s0 = inlined_call_operand.vmem [shape: f32[8,8,384], index: 0, kind: input, shape index: {}]   ;;  %s3459_s3 = inlined_call_operand.vmem [shape: f32[8,8,128], index: 3, kind: output, shape index: {}]  }
   0x1   :  { %v2310_v0 = vld [vmem:[%s3456_s1 + $0xf8] sm:$0xff]  ;;  %v2315_v1 = vld [vmem:[%s3456_s1 + $0xf0] sm:$0xff]  ;;  %v2320_v2 = vld [vmem:[%s3456_s1 + $0xe8] sm:$0xff]  ;;  %119 = vmatprep.mubr.f32.mxu0 %v3460_v3  ;;  %1923 = vmatprep.subr.mxu1 %v3460_v3 }
   0x2   :  { %55 = vmatprep.subr.mxu0 %v2310_v0  ;;  %v2328_v4 = vld [vmem:[%s3456_s1 + $0xe0] sm:$0xff]  ;;  %v2334_v5 = vld [vmem:[%s3456_s1 + $0xd8] sm:$0xff]  ;;  %v2340_v6 = vld [vmem:[%s3456_s1 + $0xd0] sm:$0xff]  ;;  %1955 = vmatprep.mubr.msk.f32.mxu1 %vm2286_vm0, %v3460_v3 }
   0x3   :  { %56 = vmatpush1.msra.mxu0 %v2315_v1  ;;  %v2346_v7 = vld [vmem:[%s3456_s1 + $0xc8] sm:$0xff]  ;;  %v2352_v8 = vld [vmem:[%s3456_s1 + $0xc0] sm:$0xff]  ;;  %v2358_v9 = vld [vmem:[%s3456_s1 + $0xb8] sm:$0xff] }
   0x4   :  { %57 = vmatprep.subr.mxu0 %v2320_v2  ;;  %v2364_v10 = vld [vmem:[%s3456_s1 + $0xb0] sm:$0xff]  ;;  %v2370_v11 = vld [vmem:[%s3456_s1 + $0xa8] sm:$0xff]  ;;  %v2376_v12 = vld [vmem:[%s3456_s1 + $0xa0] sm:$0xff] }
   0x5   :  { %58 = vmatpush1.msra.mxu0 %v2328_v4  ;;  %v2382_v13 = vld [vmem:[%s3456_s1 + $0x98] sm:$0xff]  ;;  %v2388_v14 = vld [vmem:[%s3456_s1 + $0x90] sm:$0xff]  ;;  %v2394_v15 = vld [vmem:[%s3456_s1 + $0x88] sm:$0xff] }
   0x6   :  { %59 = vmatprep.subr.mxu0 %v2334_v5  ;;  %v2400_v16 = vld [vmem:[%s3456_s1 + $0x80] sm:$0xff]  ;;  %v2406_v17 = vld [vmem:[%s3456_s1 + $0x78] sm:$0xff]  ;;  %v2412_v18 = vld [vmem:[%s3456_s1 + $0x70] sm:$0xff] }
   0x7   :  { %60 = vmatpush1.msra.mxu0 %v2340_v6  ;;  %v2418_v19 = vld [vmem:[%s3456_s1 + $0x68] sm:$0xff]  ;;  %v2424_v20 = vld [vmem:[%s3456_s1 + $0x60] sm:$0xff]  ;;  %v2430_v21 = vld [vmem:[%s3456_s1 + $0x58] sm:$0xff] }
   0x8   :  { %61 = vmatprep.subr.mxu0 %v2346_v7  ;;  %v2436_v22 = vld [vmem:[%s3456_s1 + $0x50] sm:$0xff]  ;;  %v2442_v23 = vld [vmem:[%s3456_s1 + $0x48] sm:$0xff]  ;;  %v2448_v24 = vld [vmem:[%s3456_s1 + $0x40] sm:$0xff] }
   0x9   :  { %62 = vmatpush1.msra.mxu0 %v2352_v8  ;;  %v2454_v25 = vld [vmem:[%s3456_s1 + $0x38] sm:$0xff]  ;;  %v2460_v26 = vld [vmem:[%s3456_s1 + $0x30] sm:$0xff]  ;;  %v2466_v27 = vld [vmem:[%s3456_s1 + $0x28] sm:$0xff] }
   0xa   :  { %63 = vmatprep.subr.mxu0 %v2358_v9  ;;  %v2472_v28 = vld [vmem:[%s3456_s1 + $0x20] sm:$0xff]  ;;  %v2478_v29 = vld [vmem:[%s3456_s1 + $0x18] sm:$0xff]  ;;  %v2484_v30 = vld [vmem:[%s3456_s1 + $0x10] sm:$0xff] }
   0xb   :  { %64 = vmatpush1.msra.mxu0 %v2364_v10  ;;  %v2490_v31 = vld [vmem:[%s3456_s1 + $0x8] sm:$0xff]  ;;  %v2496_v32 = vld [vmem:[%s3456_s1] sm:$0xff]  ;;  %v2539_v33 = vld [vmem:[%s3457_s2 + $0x78] sm:$0xff] }
   0xc   :  { %65 = vmatprep.subr.mxu0 %v2370_v11  ;;  %1924 = vmatpush3.msra.mxu1 %v2539_v33  ;;  %v2546_v34 = vld [vmem:[%s3457_s2 + $0x70] sm:$0xff]  ;;  %v2553_v35 = vld [vmem:[%s3457_s2 + $0x68] sm:$0xff]  ;;  %v2560_v36 = vld [vmem:[%s3457_s2 + $0x60] sm:$0xff] }
   0xd   :  { %66 = vmatpush1.msra.mxu0 %v2376_v12  ;;  %1925 = vmatprep.subr.mxu1 %v3460_v3  ;;  %v2567_v37 = vld [vmem:[%s3457_s2 + $0x58] sm:$0xff]  ;;  %v2574_v38 = vld [vmem:[%s3457_s2 + $0x50] sm:$0xff]  ;;  %v2581_v39 = vld [vmem:[%s3457_s2 + $0x48] sm:$0xff] }
   0xe   :  { %67 = vmatprep.subr.mxu0 %v2382_v13  ;;  %1926 = vmatpush3.msra.mxu1 %v2546_v34  ;;  %v2588_v40 = vld [vmem:[%s3457_s2 + $0x40] sm:$0xff]  ;;  %v2595_v41 = vld [vmem:[%s3457_s2 + $0x38] sm:$0xff]  ;;  %v2602_v42 = vld [vmem:[%s3457_s2 + $0x30] sm:$0xff] }
   0xf   :  { %68 = vmatpush1.msra.mxu0 %v2388_v14  ;;  %1927 = vmatprep.subr.mxu1 %v3460_v3  ;;  %v2607_v43 = vld [vmem:[%s3457_s2 + $0x28] sm:$0xff]  ;;  %v2616_v44 = vld [vmem:[%s3457_s2 + $0x20] sm:$0xff]  ;;  %v2623_v45 = vld [vmem:[%s3457_s2 + $0x18] sm:$0xff] }
  0x10   :  { %69 = vmatprep.subr.mxu0 %v2394_v15  ;;  %1928 = vmatpush3.msra.mxu1 %v2553_v35  ;;  %v2630_v46 = vld [vmem:[%s3457_s2 + $0x10] sm:$0xff]  ;;  %v2637_v47 = vld [vmem:[%s3457_s2 + $0x8] sm:$0xff]  ;;  %v2644_v48 = vld [vmem:[%s3457_s2] sm:$0xff] }
  0x11   :  { %70 = vmatpush1.msra.mxu0 %v2400_v16  ;;  %1929 = vmatprep.subr.mxu1 %v3460_v3  ;;  %v20_v49 = vld [vmem:[%s3458_s0] sm:$0xff]  ;;  %v21_v57 = vld [vmem:[%s3458_s0 + $0x8] sm:$0xff]  ;;  %v22_v62 = vld [vmem:[%s3458_s0 + $0x10] sm:$0xff] }
  0x12   :  { %71 = vmatprep.subr.mxu0 %v2406_v17  ;;  %1930 = vmatpush3.msra.mxu1 %v2560_v36 }
  0x13   :  { %72 = vmatpush1.msra.mxu0 %v2412_v18  ;;  %1931 = vmatprep.subr.mxu1 %v3460_v3 }
  0x14   :  { %73 = vmatprep.subr.mxu0 %v2418_v19  ;;  %1932 = vmatpush3.msra.mxu1 %v2567_v37 }
  0x15   :  { %74 = vmatpush1.msra.mxu0 %v2424_v20  ;;  %1933 = vmatprep.subr.mxu1 %v3460_v3 }
  0x16   :  { %75 = vmatprep.subr.mxu0 %v2430_v21  ;;  %1934 = vmatpush3.msra.mxu1 %v2574_v38 }
  0x17   :  { %76 = vmatpush1.msra.mxu0 %v2436_v22  ;;  %1935 = vmatprep.subr.mxu1 %v3460_v3 }
  0x18   :  { %77 = vmatprep.subr.mxu0 %v2442_v23  ;;  %1936 = vmatpush3.msra.mxu1 %v2581_v39 }
  0x19   :  { %78 = vmatpush1.msra.mxu0 %v2448_v24  ;;  %1937 = vmatprep.subr.mxu1 %v3460_v3 }
  0x1a   :  { %79 = vmatprep.subr.mxu0 %v2454_v25  ;;  %1938 = vmatpush3.msra.mxu1 %v2588_v40 }
  0x1b   :  { %80 = vmatpush1.msra.mxu0 %v2460_v26  ;;  %1939 = vmatprep.subr.mxu1 %v3460_v3 }
  0x1c   :  { %81 = vmatprep.subr.mxu0 %v2466_v27  ;;  %1940 = vmatpush3.msra.mxu1 %v2595_v41 }
  0x1d   :  { %82 = vmatpush1.msra.mxu0 %v2472_v28  ;;  %1941 = vmatprep.subr.mxu1 %v3460_v3 }
  0x1e   :  { %83 = vmatprep.subr.mxu0 %v2478_v29  ;;  %1942 = vmatpush3.msra.mxu1 %v2602_v42 }
  0x1f   :  { %84 = vmatpush1.msra.mxu0 %v2484_v30  ;;  %1943 = vmatprep.subr.mxu1 %v3460_v3 }
  0x20   :  { %85 = vmatprep.subr.mxu0 %v2490_v31  ;;  %1944 = vmatpush3.msra.mxu1 %v2607_v43 }
  0x21   :  { %86 = vmatpush1.msra.mxu0 %v2496_v32  ;;  %1945 = vmatprep.subr.mxu1 %v3460_v3 }
  0x22   :  { %120 = vmatmul.mubr.f32.vlgmr.msra.gmra.mxu0 %v3460_v3  ;;  %269 = vmatprep.subr.mxu0 %v2310_v0 }
  0x23   :  { %270 = vmatpush1.msra.mxu0 %v2315_v1  ;;  %333 = vmatprep.mubr.f32.mxu0 %v3460_v3 }
  0x24   :  { %271 = vmatprep.subr.mxu0 %v2320_v2  ;;  %1946 = vmatpush3.msra.mxu1 %v2616_v44 }
  0x25   :  { %272 = vmatpush1.msra.mxu0 %v2328_v4  ;;  %1947 = vmatprep.subr.mxu1 %v3460_v3 }
  0x26   :  { %273 = vmatprep.subr.mxu0 %v2334_v5  ;;  %1948 = vmatpush3.msra.mxu1 %v2623_v45 }
  0x27   :  { %274 = vmatpush1.msra.mxu0 %v2340_v6  ;;  %1949 = vmatprep.subr.mxu1 %v3460_v3 }
  0x28   :  { %275 = vmatprep.subr.mxu0 %v2346_v7  ;;  %1950 = vmatpush3.msra.mxu1 %v2630_v46 }
  0x29   :  { %276 = vmatpush1.msra.mxu0 %v2352_v8  ;;  %1951 = vmatprep.subr.mxu1 %v3460_v3 }
  0x2a   :  { %277 = vmatprep.subr.mxu0 %v2358_v9  ;;  %1952 = vmatpush3.msra.mxu1 %v2637_v47 }
  0x2b   :  { %278 = vmatpush1.msra.mxu0 %v2364_v10  ;;  %1953 = vmatprep.subr.mxu1 %v3460_v3 }
  0x2c   :  { %279 = vmatprep.subr.mxu0 %v2370_v11  ;;  %1954 = vmatpush3.msra.mxu1 %v2644_v48 }
  0x2d   :  { %280 = vmatpush1.msra.mxu0 %v2376_v12  ;;  %1958 = vmatprep.subr.mxu1 %v3460_v3 }
  0x2e   :  { %281 = vmatprep.subr.mxu0 %v2382_v13 }
  0x2f   :  { %282 = vmatpush1.msra.mxu0 %v2388_v14 }
  0x30   :  { %283 = vmatprep.subr.mxu0 %v2394_v15 }
  0x31   :  { %284 = vmatpush1.msra.mxu0 %v2400_v16 }
  0x32   :  { %285 = vmatprep.subr.mxu0 %v2406_v17 }
  0x33   :  { %286 = vmatpush1.msra.mxu0 %v2412_v18 }
  0x34   :  { %287 = vmatprep.subr.mxu0 %v2418_v19 }
  0x35   :  { %288 = vmatpush1.msra.mxu0 %v2424_v20 }
  0x36   :  { %289 = vmatprep.subr.mxu0 %v2430_v21 }
  0x37   :  { %290 = vmatpush1.msra.mxu0 %v2436_v22 }
  0x38   :  { %291 = vmatprep.subr.mxu0 %v2442_v23 }
  0x39   :  { %292 = vmatpush1.msra.mxu0 %v2448_v24 }
  0x3a   :  { %293 = vmatprep.subr.mxu0 %v2454_v25 }
  0x3b   :  { %294 = vmatpush1.msra.mxu0 %v2460_v26 }
  0x3c   :  { %295 = vmatprep.subr.mxu0 %v2466_v27 }
  0x3d   :  { %296 = vmatpush1.msra.mxu0 %v2472_v28 }
  0x3e   :  { %297 = vmatprep.subr.mxu0 %v2478_v29 }
  0x3f   :  { %298 = vmatpush1.msra.mxu0 %v2484_v30 }
  0x40   :  { %299 = vmatprep.subr.mxu0 %v2490_v31 }
  0x41   :  { %300 = vmatpush1.msra.mxu0 %v2496_v32 }
  0x42   :  { %484 = vmatprep.subr.mxu0 %v2310_v0 }
  0xe2   :  { %v121_v50 = vpop.f32.mrf.mxu0 }
  0xe3   :  { %v126_v51 = vadd.f32 %v121_v50, %v20_v49 }
  0xe4   :  { %v123_v58 = vpop.f32.mrf.mxu0 }
  0xe5   :  { %v1743_v52 = vmul.f32 -1.442695, %v126_v51  ;;  %v127_v59 = vadd.f32 %v123_v58, %v21_v57  ;;  %v1745_v57 = vld [vmem:[%s3458_s0 + $0x18] sm:$0xff] }
  0xe7   :  { %2205 = vpow2.f32 %v1743_v52  ;;  %v1744_v60 = vmul.f32 -1.442695, %v127_v59 }
  0xf4   :  { %v2206_v53 = vpop.eup %2205 }
  0xf5   :  { %v134_v54 = vadd.f32 1.0, %v2206_v53 }
  0xf7   :  { %2207 = vrcp.f32 %v134_v54 }
  0xf8   :  { %2209 = vpow2.f32 %v1744_v60 }
 0x104   :  { %v2208_v55 = vpop.eup %2207 }
 0x105   :  { %v140_v56 = vmul.f32 0.0, %v2208_v55  ;;  %v2210_v61 = vpop.eup %2209 }
 0x106   :  { %v135_v49 = vadd.f32 1.0, %v2210_v61 }
 0x107   :  { %1956 = vmatmul.mubr.f32.vlgmr.msra.gmra.mxu1 %v140_v56 }
 0x108   :  { %1959 = vmatpush3.msra.mxu1 %v2539_v33  ;;  %1990 = vmatprep.mubr.msk.f32.mxu1 %vm2286_vm0, %v3460_v3 }
 0x109   :  { %1960 = vmatprep.subr.mxu1 %v3460_v3 }
 0x10a   :  { %1961 = vmatpush3.msra.mxu1 %v2546_v34 }
 0x10b   :  { %1962 = vmatprep.subr.mxu1 %v3460_v3 }
 0x10c   :  { %1963 = vmatpush3.msra.mxu1 %v2553_v35 }
 0x10d   :  { %1964 = vmatprep.subr.mxu1 %v3460_v3 }
 0x10e   :  { %1965 = vmatpush3.msra.mxu1 %v2560_v36 }
 0x10f   :  { %1966 = vmatprep.subr.mxu1 %v3460_v3 }
 0x110   :  { %1967 = vmatpush3.msra.mxu1 %v2567_v37 }
 0x111   :  { %1968 = vmatprep.subr.mxu1 %v3460_v3 }
 0x112   :  { %1969 = vmatpush3.msra.mxu1 %v2574_v38 }
 0x113   :  { %1970 = vmatprep.subr.mxu1 %v3460_v3 }
 0x114   :  { %1971 = vmatpush3.msra.mxu1 %v2581_v39 }
 0x115   :  { %1972 = vmatprep.subr.mxu1 %v3460_v3 }
 0x116   :  { %1973 = vmatpush3.msra.mxu1 %v2588_v40 }
 0x117   :  { %1974 = vmatprep.subr.mxu1 %v3460_v3 }
 0x118   :  { %1975 = vmatpush3.msra.mxu1 %v2595_v41 }
 0x119   :  { %1976 = vmatprep.subr.mxu1 %v3460_v3 }
 0x11a   :  { %1977 = vmatpush3.msra.mxu1 %v2602_v42 }
 0x11b   :  { %1978 = vmatprep.subr.mxu1 %v3460_v3 }
 0x11c   :  { %1979 = vmatpush3.msra.mxu1 %v2607_v43 }
 0x11d   :  { %1980 = vmatprep.subr.mxu1 %v3460_v3 }
 0x11e   :  { %1981 = vmatpush3.msra.mxu1 %v2616_v44 }
 0x11f   :  { %1982 = vmatprep.subr.mxu1 %v3460_v3 }
 0x120   :  { %1983 = vmatpush3.msra.mxu1 %v2623_v45 }
 0x121   :  { %1984 = vmatprep.subr.mxu1 %v3460_v3 }
 0x122   :  { %1985 = vmatpush3.msra.mxu1 %v2630_v46 }
 0x123   :  { %1986 = vmatprep.subr.mxu1 %v3460_v3 }
 0x124   :  { %1987 = vmatpush3.msra.mxu1 %v2637_v47 }
 0x125   :  { %1988 = vmatprep.subr.mxu1 %v3460_v3 }
 0x126   :  { %1989 = vmatpush3.msra.mxu1 %v2644_v48 }
 0x127   :  { %1993 = vmatprep.subr.mxu1 %v3460_v3 }
 0x1c7   :  { %v223_v63 = vpop.f32.mrf.mxu1 }
 0x1c8   :  { %v227_v50 = vadd.f32 %v223_v63, %v22_v62 }
 0x1c9   :  { %v1957_v51 = vpop.f32.mrf.mxu1 }
 0x1ca   :  { %2211 = vtanh.f32 %v227_v50 }
 0x1cb   :  { %2213 = vrcp.f32 %v135_v49 }
 0x1d7   :  { %v2212_v52 = vpop.eup %2211 }
 0x1d8   :  { %v229_v53 = vsub.f32 0.0, %v2212_v52  ;;  %v2214_v54 = vpop.eup %2213 }
 0x1da   :  { %v230_v55 = vmul.f32 %v2214_v54, %v229_v53  ;;  %v1747_v54 = vld [vmem:[%s3458_s0 + $0x28] sm:$0xff] }
 0x1dc   :  { %v2693_v56 = vadd.f32 %v2212_v52, %v230_v55 }
 0x1de   :  { %232 = vst [vmem:[%s3459_s3] sm:$0xff] %v2693_v56  ;;  %334 = vmatmul.mubr.f32.vlgmr.msra.gmra.mxu0 %v2693_v56 }
 0x1df   :  { %485 = vmatpush1.msra.mxu0 %v2315_v1  ;;  %548 = vmatprep.mubr.f32.mxu0 %v3460_v3 }
 0x1e0   :  { %486 = vmatprep.subr.mxu0 %v2320_v2 }
 0x1e1   :  { %487 = vmatpush1.msra.mxu0 %v2328_v4 }
 0x1e2   :  { %488 = vmatprep.subr.mxu0 %v2334_v5 }
 0x1e3   :  { %489 = vmatpush1.msra.mxu0 %v2340_v6 }
 0x1e4   :  { %490 = vmatprep.subr.mxu0 %v2346_v7 }
 0x1e5   :  { %491 = vmatpush1.msra.mxu0 %v2352_v8 }
 0x1e6   :  { %492 = vmatprep.subr.mxu0 %v2358_v9 }
 0x1e7   :  { %493 = vmatpush1.msra.mxu0 %v2364_v10 }
 0x1e8   :  { %494 = vmatprep.subr.mxu0 %v2370_v11 }
 0x1e9   :  { %495 = vmatpush1.msra.mxu0 %v2376_v12 }
 0x1ea   :  { %496 = vmatprep.subr.mxu0 %v2382_v13 }
 0x1eb   :  { %497 = vmatpush1.msra.mxu0 %v2388_v14 }
 0x1ec   :  { %498 = vmatprep.subr.mxu0 %v2394_v15 }
 0x1ed   :  { %499 = vmatpush1.msra.mxu0 %v2400_v16 }
 0x1ee   :  { %500 = vmatprep.subr.mxu0 %v2406_v17 }
 0x1ef   :  { %501 = vmatpush1.msra.mxu0 %v2412_v18 }
 0x1f0   :  { %502 = vmatprep.subr.mxu0 %v2418_v19 }
 0x1f1   :  { %503 = vmatpush1.msra.mxu0 %v2424_v20 }
 0x1f2   :  { %504 = vmatprep.subr.mxu0 %v2430_v21 }
 0x1f3   :  { %505 = vmatpush1.msra.mxu0 %v2436_v22 }
 0x1f4   :  { %506 = vmatprep.subr.mxu0 %v2442_v23 }
 0x1f5   :  { %507 = vmatpush1.msra.mxu0 %v2448_v24 }
 0x1f6   :  { %508 = vmatprep.subr.mxu0 %v2454_v25 }
 0x1f7   :  { %509 = vmatpush1.msra.mxu0 %v2460_v26 }
 0x1f8   :  { %510 = vmatprep.subr.mxu0 %v2466_v27 }
 0x1f9   :  { %511 = vmatpush1.msra.mxu0 %v2472_v28 }
 0x1fa   :  { %512 = vmatprep.subr.mxu0 %v2478_v29 }
 0x1fb   :  { %513 = vmatpush1.msra.mxu0 %v2484_v30 }
 0x1fc   :  { %514 = vmatprep.subr.mxu0 %v2490_v31 }
 0x1fd   :  { %515 = vmatpush1.msra.mxu0 %v2496_v32 }
 0x1fe   :  { %699 = vmatprep.subr.mxu0 %v2310_v0  ;;  %v1746_v0 = vld [vmem:[%s3458_s0 + $0x20] sm:$0xff] }
 0x29e   :  { %v335_v58 = vpop.f32.mrf.mxu0 }
 0x29f   :  { %v340_v59 = vadd.f32 %v1745_v57, %v335_v58 }
 0x2a0   :  { %v337_v50 = vpop.f32.mrf.mxu0 }
 0x2a1   :  { %v1748_v60 = vmul.f32 -1.442695, %v340_v59  ;;  %v341_v51 = vadd.f32 %v1746_v0, %v337_v50  ;;  %v2979_v0 = vld [vmem:[%s3456_s1 + $0x70] sm:$0xff]  ;;  %v2985_v50 = vld [vmem:[%s3456_s1 + $0x68] sm:$0xff] }
 0x2a3   :  { %2215 = vpow2.f32 %v1748_v60  ;;  %v1749_v52 = vmul.f32 -1.442695, %v341_v51  ;;  %v2991_v51 = vld [vmem:[%s3456_s1 + $0x60] sm:$0xff] }
 0x2b0   :  { %v2216_v61 = vpop.eup %2215 }
 0x2b1   :  { %v348_v62 = vadd.f32 1.0, %v2216_v61 }
 0x2b3   :  { %2217 = vrcp.f32 %v348_v62 }
 0x2b4   :  { %2219 = vpow2.f32 %v1749_v52  ;;  %v2997_v52 = vld [vmem:[%s3456_s1 + $0x58] sm:$0xff] }
 0x2c0   :  { %v2218_v63 = vpop.eup %2217 }
 0x2c1   :  { %v354_v49 = vmul.f32 %v2218_v63, %v2693_v56  ;;  %v2220_v53 = vpop.eup %2219 }
 0x2c2   :  { %v349_v57 = vadd.f32 1.0, %v2220_v53  ;;  %v3003_v53 = vld [vmem:[%s3456_s1 + $0x50] sm:$0xff] }
 0x2c3   :  { %1991 = vmatmul.mubr.f32.vlgmr.msra.gmra.mxu1 %v354_v49 }
 0x2c4   :  { %1994 = vmatpush3.msra.mxu1 %v2539_v33  ;;  %2025 = vmatprep.mubr.msk.f32.mxu1 %vm2286_vm0, %v3460_v3 }
 0x2c5   :  { %1995 = vmatprep.subr.mxu1 %v3460_v3 }
 0x2c6   :  { %1996 = vmatpush3.msra.mxu1 %v2546_v34 }
 0x2c7   :  { %1997 = vmatprep.subr.mxu1 %v3460_v3 }
 0x2c8   :  { %1998 = vmatpush3.msra.mxu1 %v2553_v35 }
 0x2c9   :  { %1999 = vmatprep.subr.mxu1 %v3460_v3 }
 0x2ca   :  { %2000 = vmatpush3.msra.mxu1 %v2560_v36 }
 0x2cb   :  { %2001 = vmatprep.subr.mxu1 %v3460_v3 }
 0x2cc   :  { %2002 = vmatpush3.msra.mxu1 %v2567_v37 }
 0x2cd   :  { %2003 = vmatprep.subr.mxu1 %v3460_v3 }
 0x2ce   :  { %2004 = vmatpush3.msra.mxu1 %v2574_v38 }
 0x2cf   :  { %2005 = vmatprep.subr.mxu1 %v3460_v3 }
 0x2d0   :  { %2006 = vmatpush3.msra.mxu1 %v2581_v39 }
 0x2d1   :  { %2007 = vmatprep.subr.mxu1 %v3460_v3 }
 0x2d2   :  { %2008 = vmatpush3.msra.mxu1 %v2588_v40 }
 0x2d3   :  { %2009 = vmatprep.subr.mxu1 %v3460_v3 }
 0x2d4   :  { %2010 = vmatpush3.msra.mxu1 %v2595_v41 }
 0x2d5   :  { %2011 = vmatprep.subr.mxu1 %v3460_v3 }
 0x2d6   :  { %2012 = vmatpush3.msra.mxu1 %v2602_v42 }
 0x2d7   :  { %2013 = vmatprep.subr.mxu1 %v3460_v3 }
 0x2d8   :  { %2014 = vmatpush3.msra.mxu1 %v2607_v43 }
 0x2d9   :  { %2015 = vmatprep.subr.mxu1 %v3460_v3 }
 0x2da   :  { %2016 = vmatpush3.msra.mxu1 %v2616_v44 }
 0x2db   :  { %2017 = vmatprep.subr.mxu1 %v3460_v3 }
 0x2dc   :  { %2018 = vmatpush3.msra.mxu1 %v2623_v45 }
 0x2dd   :  { %2019 = vmatprep.subr.mxu1 %v3460_v3 }
 0x2de   :  { %2020 = vmatpush3.msra.mxu1 %v2630_v46 }
 0x2df   :  { %2021 = vmatprep.subr.mxu1 %v3460_v3 }
 0x2e0   :  { %2022 = vmatpush3.msra.mxu1 %v2637_v47 }
 0x2e1   :  { %2023 = vmatprep.subr.mxu1 %v3460_v3 }
 0x2e2   :  { %2024 = vmatpush3.msra.mxu1 %v2644_v48 }
 0x2e3   :  { %2028 = vmatprep.subr.mxu1 %v3460_v3 }
 0x383   :  { %v437_v55 = vpop.f32.mrf.mxu1 }
 0x384   :  { %v441_v58 = vadd.f32 %v1747_v54, %v437_v55  ;;  %v3009_v54 = vld [vmem:[%s3456_s1 + $0x48] sm:$0xff]  ;;  %v3015_v55 = vld [vmem:[%s3456_s1 + $0x40] sm:$0xff] }
 0x385   :  { %v1992_v59 = vpop.f32.mrf.mxu1 }
 0x386   :  { %2221 = vtanh.f32 %v441_v58  ;;  %v3027_v58 = vld [vmem:[%s3456_s1 + $0x30] sm:$0xff]  ;;  %v3033_v59 = vld [vmem:[%s3456_s1 + $0x28] sm:$0xff] }
 0x387   :  { %2223 = vrcp.f32 %v349_v57  ;;  %v3021_v57 = vld [vmem:[%s3456_s1 + $0x38] sm:$0xff] }
 0x393   :  { %v2222_v60 = vpop.eup %2221 }
 0x394   :  { %v443_v61 = vsub.f32 %v2693_v56, %v2222_v60  ;;  %v2224_v62 = vpop.eup %2223  ;;  %v2973_v56 = vld [vmem:[%s3456_s1 + $0x78] sm:$0xff] }
 0x396   :  { %v444_v63 = vmul.f32 %v2224_v62, %v443_v61  ;;  %v3045_v61 = vld [vmem:[%s3456_s1 + $0x18] sm:$0xff]  ;;  %v3051_v62 = vld [vmem:[%s3456_s1 + $0x10] sm:$0xff] }
 0x398   :  { %v2778_v49 = vadd.f32 %v2222_v60, %v444_v63  ;;  %v3039_v60 = vld [vmem:[%s3456_s1 + $0x20] sm:$0xff]  ;;  %v3057_v63 = vld [vmem:[%s3456_s1 + $0x8] sm:$0xff] }
 0x39a   :  { %1750 = vst [vmem:[%s3459_s3 + $0x8] sm:$0xff] %v2778_v49  ;;  %549 = vmatmul.mubr.f32.vlgmr.msra.gmra.mxu0 %v2778_v49 }
 0x39b   :  { %700 = vmatpush1.msra.mxu0 %v2315_v1  ;;  %763 = vmatprep.mubr.f32.mxu0 %v3460_v3  ;;  %v1751_v1 = vld [vmem:[%s3458_s0 + $0x30] sm:$0xff] }
 0x39c   :  { %701 = vmatprep.subr.mxu0 %v2320_v2 }
 0x39d   :  { %702 = vmatpush1.msra.mxu0 %v2328_v4 }
 0x39e   :  { %703 = vmatprep.subr.mxu0 %v2334_v5 }
 0x39f   :  { %704 = vmatpush1.msra.mxu0 %v2340_v6 }
 0x3a0   :  { %705 = vmatprep.subr.mxu0 %v2346_v7 }
 0x3a1   :  { %706 = vmatpush1.msra.mxu0 %v2352_v8 }
 0x3a2   :  { %707 = vmatprep.subr.mxu0 %v2358_v9 }
 0x3a3   :  { %708 = vmatpush1.msra.mxu0 %v2364_v10  ;;  %v1752_v10 = vld [vmem:[%s3458_s0 + $0x38] sm:$0xff] }
 0x3a4   :  { %709 = vmatprep.subr.mxu0 %v2370_v11 }
 0x3a5   :  { %710 = vmatpush1.msra.mxu0 %v2376_v12 }
 0x3a6   :  { %711 = vmatprep.subr.mxu0 %v2382_v13 }
 0x3a7   :  { %712 = vmatpush1.msra.mxu0 %v2388_v14 }
 0x3a8   :  { %713 = vmatprep.subr.mxu0 %v2394_v15  ;;  %v1753_v15 = vld [vmem:[%s3458_s0 + $0x40] sm:$0xff] }
 0x3a9   :  { %714 = vmatpush1.msra.mxu0 %v2400_v16 }
 0x3aa   :  { %715 = vmatprep.subr.mxu0 %v2406_v17 }
 0x3ab   :  { %716 = vmatpush1.msra.mxu0 %v2412_v18 }
 0x3ac   :  { %717 = vmatprep.subr.mxu0 %v2418_v19 }
 0x3ad   :  { %718 = vmatpush1.msra.mxu0 %v2424_v20 }
 0x3ae   :  { %719 = vmatprep.subr.mxu0 %v2430_v21 }
 0x3af   :  { %720 = vmatpush1.msra.mxu0 %v2436_v22 }
 0x3b0   :  { %721 = vmatprep.subr.mxu0 %v2442_v23 }
 0x3b1   :  { %722 = vmatpush1.msra.mxu0 %v2448_v24 }
 0x3b2   :  { %723 = vmatprep.subr.mxu0 %v2454_v25  ;;  %v2873_v25 = vld [vmem:[%s3456_s1 + $0xf8] sm:$0xff] }
 0x3b3   :  { %724 = vmatpush1.msra.mxu0 %v2460_v26  ;;  %v2878_v26 = vld [vmem:[%s3456_s1 + $0xf0] sm:$0xff] }
 0x3b4   :  { %725 = vmatprep.subr.mxu0 %v2466_v27  ;;  %v2883_v27 = vld [vmem:[%s3456_s1 + $0xe8] sm:$0xff] }
 0x3b5   :  { %726 = vmatpush1.msra.mxu0 %v2472_v28  ;;  %v2889_v28 = vld [vmem:[%s3456_s1 + $0xe0] sm:$0xff] }
 0x3b6   :  { %727 = vmatprep.subr.mxu0 %v2478_v29  ;;  %v2895_v29 = vld [vmem:[%s3456_s1 + $0xd8] sm:$0xff] }
 0x3b7   :  { %728 = vmatpush1.msra.mxu0 %v2484_v30  ;;  %v2901_v30 = vld [vmem:[%s3456_s1 + $0xd0] sm:$0xff] }
 0x3b8   :  { %729 = vmatprep.subr.mxu0 %v2490_v31  ;;  %v2907_v31 = vld [vmem:[%s3456_s1 + $0xc8] sm:$0xff] }
 0x3b9   :  { %730 = vmatpush1.msra.mxu0 %v2496_v32  ;;  %v2913_v32 = vld [vmem:[%s3456_s1 + $0xc0] sm:$0xff] }
 0x3ba   :  { %914 = vmatprep.subr.mxu0 %v2873_v25 }
 0x45a   :  { %v550_v2 = vpop.f32.mrf.mxu0 }
 0x45b   :  { %v555_v4 = vadd.f32 %v1751_v1, %v550_v2  ;;  %v1758_v1 = vld [vmem:[%s3458_s0 + $0x50] sm:$0xff] }
 0x45c   :  { %v552_v11 = vpop.f32.mrf.mxu0 }
 0x45d   :  { %v1754_v5 = vmul.f32 -1.442695, %v555_v4  ;;  %v556_v12 = vadd.f32 %v1752_v10, %v552_v11 }
 0x45f   :  { %2225 = vpow2.f32 %v1754_v5  ;;  %v1755_v13 = vmul.f32 -1.442695, %v556_v12 }
 0x46c   :  { %v2226_v6 = vpop.eup %2225 }
 0x46d   :  { %v563_v7 = vadd.f32 1.0, %v2226_v6 }
 0x46f   :  { %2227 = vrcp.f32 %v563_v7  ;;  %v1759_v7 = vld [vmem:[%s3458_s0 + $0x58] sm:$0xff] }
 0x470   :  { %2229 = vpow2.f32 %v1755_v13 }
 0x47c   :  { %v2228_v8 = vpop.eup %2227 }
 0x47d   :  { %v569_v9 = vmul.f32 %v2228_v8, %v2778_v49  ;;  %v2230_v14 = vpop.eup %2229 }
 0x47e   :  { %v564_v17 = vadd.f32 1.0, %v2230_v14 }
 0x47f   :  { %2026 = vmatmul.mubr.f32.vlgmr.msra.gmra.mxu1 %v569_v9 }
 0x480   :  { %2029 = vmatpush3.msra.mxu1 %v2539_v33  ;;  %2060 = vmatprep.mubr.msk.f32.mxu1 %vm2286_vm0, %v3460_v3  ;;  %v2919_v33 = vld [vmem:[%s3456_s1 + $0xb8] sm:$0xff] }
 0x481   :  { %2030 = vmatprep.subr.mxu1 %v3460_v3 }
 0x482   :  { %2031 = vmatpush3.msra.mxu1 %v2546_v34  ;;  %v1757_v34 = vld [vmem:[%s3458_s0 + $0x48] sm:$0xff] }
 0x483   :  { %2032 = vmatprep.subr.mxu1 %v3460_v3 }
 0x484   :  { %2033 = vmatpush3.msra.mxu1 %v2553_v35 }
 0x485   :  { %2034 = vmatprep.subr.mxu1 %v3460_v3 }
 0x486   :  { %2035 = vmatpush3.msra.mxu1 %v2560_v36 }
 0x487   :  { %2036 = vmatprep.subr.mxu1 %v3460_v3 }
 0x488   :  { %2037 = vmatpush3.msra.mxu1 %v2567_v37 }
 0x489   :  { %2038 = vmatprep.subr.mxu1 %v3460_v3 }
 0x48a   :  { %2039 = vmatpush3.msra.mxu1 %v2574_v38 }
 0x48b   :  { %2040 = vmatprep.subr.mxu1 %v3460_v3 }
 0x48c   :  { %2041 = vmatpush3.msra.mxu1 %v2581_v39 }
 0x48d   :  { %2042 = vmatprep.subr.mxu1 %v3460_v3 }
 0x48e   :  { %2043 = vmatpush3.msra.mxu1 %v2588_v40 }
 0x48f   :  { %2044 = vmatprep.subr.mxu1 %v3460_v3 }
 0x490   :  { %2045 = vmatpush3.msra.mxu1 %v2595_v41 }
 0x491   :  { %2046 = vmatprep.subr.mxu1 %v3460_v3 }
 0x492   :  { %2047 = vmatpush3.msra.mxu1 %v2602_v42  ;;  %v2933_v42 = vld [vmem:[%s3456_s1 + $0xb0] sm:$0xff] }
 0x493   :  { %2048 = vmatprep.subr.mxu1 %v3460_v3 }
 0x494   :  { %2049 = vmatpush3.msra.mxu1 %v2607_v43  ;;  %v2939_v43 = vld [vmem:[%s3456_s1 + $0xa8] sm:$0xff] }
 0x495   :  { %2050 = vmatprep.subr.mxu1 %v3460_v3 }
 0x496   :  { %2051 = vmatpush3.msra.mxu1 %v2616_v44  ;;  %v2945_v44 = vld [vmem:[%s3456_s1 + $0xa0] sm:$0xff] }
 0x497   :  { %2052 = vmatprep.subr.mxu1 %v3460_v3 }
 0x498   :  { %2053 = vmatpush3.msra.mxu1 %v2623_v45  ;;  %v2951_v45 = vld [vmem:[%s3456_s1 + $0x98] sm:$0xff] }
 0x499   :  { %2054 = vmatprep.subr.mxu1 %v3460_v3 }
 0x49a   :  { %2055 = vmatpush3.msra.mxu1 %v2630_v46  ;;  %v2957_v46 = vld [vmem:[%s3456_s1 + $0x90] sm:$0xff] }
 0x49b   :  { %2056 = vmatprep.subr.mxu1 %v3460_v3 }
 0x49c   :  { %2057 = vmatpush3.msra.mxu1 %v2637_v47  ;;  %v2962_v47 = vld [vmem:[%s3456_s1 + $0x88] sm:$0xff] }
 0x49d   :  { %2058 = vmatprep.subr.mxu1 %v3460_v3 }
 0x49e   :  { %2059 = vmatpush3.msra.mxu1 %v2644_v48  ;;  %v2967_v48 = vld [vmem:[%s3456_s1 + $0x80] sm:$0xff] }
 0x49f   :  { %2063 = vmatprep.subr.mxu1 %v3460_v3 }
 0x53f   :  { %v652_v16 = vpop.f32.mrf.mxu1 }
 0x540   :  { %v656_v18 = vadd.f32 %v1753_v15, %v652_v16 }
 0x541   :  { %v2027_v19 = vpop.f32.mrf.mxu1 }
 0x542   :  { %2231 = vtanh.f32 %v656_v18  ;;  %v3126_v18 = vld [vmem:[%s3457_s2 + $0x70] sm:$0xff]  ;;  %v3133_v19 = vld [vmem:[%s3457_s2 + $0x68] sm:$0xff] }
 0x543   :  { %2233 = vrcp.f32 %v564_v17  ;;  %v3119_v17 = vld [vmem:[%s3457_s2 + $0x78] sm:$0xff] }
 0x54f   :  { %v2232_v20 = vpop.eup %2231 }
 0x550   :  { %v658_v21 = vsub.f32 %v2778_v49, %v2232_v20  ;;  %v2234_v22 = vpop.eup %2233  ;;  %v3063_v49 = vld [vmem:[%s3456_s1] sm:$0xff] }
 0x552   :  { %v659_v23 = vmul.f32 %v2234_v22, %v658_v21  ;;  %v3147_v21 = vld [vmem:[%s3457_s2 + $0x58] sm:$0xff]  ;;  %v3154_v22 = vld [vmem:[%s3457_s2 + $0x50] sm:$0xff] }
 0x554   :  { %v2862_v24 = vadd.f32 %v2232_v20, %v659_v23  ;;  %v3140_v20 = vld [vmem:[%s3457_s2 + $0x60] sm:$0xff]  ;;  %v3161_v23 = vld [vmem:[%s3457_s2 + $0x48] sm:$0xff] }
 0x556   :  { %1756 = vst [vmem:[%s3459_s3 + $0x10] sm:$0xff] %v2862_v24  ;;  %764 = vmatmul.mubr.f32.vlgmr.msra.gmra.mxu0 %v2862_v24 }
 0x557   :  { %978 = vmatprep.mubr.f32.mxu0 %v3460_v3  ;;  %915 = vmatpush1.msra.mxu0 %v2878_v26 }
 0x558   :  { %916 = vmatprep.subr.mxu0 %v2883_v27 }
 0x559   :  { %917 = vmatpush1.msra.mxu0 %v2889_v28 }
 0x55a   :  { %918 = vmatprep.subr.mxu0 %v2895_v29 }
 0x55b   :  { %919 = vmatpush1.msra.mxu0 %v2901_v30 }
 0x55c   :  { %920 = vmatprep.subr.mxu0 %v2907_v31 }
 0x55d   :  { %921 = vmatpush1.msra.mxu0 %v2913_v32 }
 0x55e   :  { %922 = vmatprep.subr.mxu0 %v2919_v33 }
 0x55f   :  { %923 = vmatpush1.msra.mxu0 %v2933_v42 }
 0x560   :  { %924 = vmatprep.subr.mxu0 %v2939_v43 }
 0x561   :  { %925 = vmatpush1.msra.mxu0 %v2945_v44 }
 0x562   :  { %926 = vmatprep.subr.mxu0 %v2951_v45 }
 0x563   :  { %927 = vmatpush1.msra.mxu0 %v2957_v46 }
 0x564   :  { %928 = vmatprep.subr.mxu0 %v2962_v47 }
 0x565   :  { %929 = vmatpush1.msra.mxu0 %v2967_v48 }
 0x566   :  { %930 = vmatprep.subr.mxu0 %v2973_v56 }
 0x567   :  { %931 = vmatpush1.msra.mxu0 %v2979_v0 }
 0x568   :  { %932 = vmatprep.subr.mxu0 %v2985_v50 }
 0x569   :  { %933 = vmatpush1.msra.mxu0 %v2991_v51 }
 0x56a   :  { %934 = vmatprep.subr.mxu0 %v2997_v52 }
 0x56b   :  { %935 = vmatpush1.msra.mxu0 %v3003_v53 }
 0x56c   :  { %936 = vmatprep.subr.mxu0 %v3009_v54 }
 0x56d   :  { %937 = vmatpush1.msra.mxu0 %v3015_v55 }
 0x56e   :  { %938 = vmatprep.subr.mxu0 %v3021_v57 }
 0x56f   :  { %939 = vmatpush1.msra.mxu0 %v3027_v58 }
 0x570   :  { %940 = vmatprep.subr.mxu0 %v3033_v59 }
 0x571   :  { %941 = vmatpush1.msra.mxu0 %v3039_v60 }
 0x572   :  { %942 = vmatprep.subr.mxu0 %v3045_v61 }
 0x573   :  { %943 = vmatpush1.msra.mxu0 %v3051_v62 }
 0x574   :  { %944 = vmatprep.subr.mxu0 %v3057_v63 }
 0x575   :  { %945 = vmatpush1.msra.mxu0 %v3063_v49 }
 0x576   :  { %1129 = vmatprep.subr.mxu0 %v2873_v25 }
 0x616   :  { %v765_v35 = vpop.f32.mrf.mxu0 }
 0x617   :  { %v770_v36 = vadd.f32 %v1757_v34, %v765_v35  ;;  %v3175_v34 = vld [vmem:[%s3457_s2 + $0x38] sm:$0xff]  ;;  %v3182_v35 = vld [vmem:[%s3457_s2 + $0x30] sm:$0xff] }
 0x618   :  { %v767_v2 = vpop.f32.mrf.mxu0 }
 0x619   :  { %v1760_v37 = vmul.f32 -1.442695, %v770_v36  ;;  %v771_v4 = vadd.f32 %v1758_v1, %v767_v2  ;;  %v3187_v36 = vld [vmem:[%s3457_s2 + $0x28] sm:$0xff]  ;;  %v1763_v1 = vld [vmem:[%s3458_s0 + $0x60] sm:$0xff] }
 0x61b   :  { %2235 = vpow2.f32 %v1760_v37  ;;  %v1761_v5 = vmul.f32 -1.442695, %v771_v4  ;;  %v3194_v37 = vld [vmem:[%s3457_s2 + $0x20] sm:$0xff] }
 0x628   :  { %v2236_v38 = vpop.eup %2235 }
 0x629   :  { %v778_v39 = vadd.f32 1.0, %v2236_v38  ;;  %v3201_v38 = vld [vmem:[%s3457_s2 + $0x18] sm:$0xff] }
 0x62b   :  { %2237 = vrcp.f32 %v778_v39  ;;  %v3208_v39 = vld [vmem:[%s3457_s2 + $0x10] sm:$0xff] }
 0x62c   :  { %2239 = vpow2.f32 %v1761_v5 }
 0x638   :  { %v2238_v40 = vpop.eup %2237 }
 0x639   :  { %v784_v41 = vmul.f32 %v2238_v40, %v2862_v24  ;;  %v2240_v6 = vpop.eup %2239  ;;  %v3215_v40 = vld [vmem:[%s3457_s2 + $0x8] sm:$0xff] }
 0x63a   :  { %v779_v9 = vadd.f32 1.0, %v2240_v6 }
 0x63b   :  { %2061 = vmatmul.mubr.f32.vlgmr.msra.gmra.mxu1 %v784_v41  ;;  %v3222_v41 = vld [vmem:[%s3457_s2] sm:$0xff] }
 0x63c   :  { %2095 = vmatprep.mubr.msk.f32.mxu1 %vm2286_vm0, %v3460_v3  ;;  %2064 = vmatpush3.msra.mxu1 %v3119_v17 }
 0x63d   :  { %2065 = vmatprep.subr.mxu1 %v3460_v3 }
 0x63e   :  { %2066 = vmatpush3.msra.mxu1 %v3126_v18 }
 0x63f   :  { %2067 = vmatprep.subr.mxu1 %v3460_v3 }
 0x640   :  { %2068 = vmatpush3.msra.mxu1 %v3133_v19 }
 0x641   :  { %2069 = vmatprep.subr.mxu1 %v3460_v3 }
 0x642   :  { %2070 = vmatpush3.msra.mxu1 %v3140_v20 }
 0x643   :  { %2071 = vmatprep.subr.mxu1 %v3460_v3 }
 0x644   :  { %2072 = vmatpush3.msra.mxu1 %v3147_v21 }
 0x645   :  { %2073 = vmatprep.subr.mxu1 %v3460_v3 }
 0x646   :  { %2074 = vmatpush3.msra.mxu1 %v3154_v22 }
 0x647   :  { %2075 = vmatprep.subr.mxu1 %v3460_v3 }
 0x648   :  { %2076 = vmatpush3.msra.mxu1 %v3161_v23 }
 0x649   :  { %2077 = vmatprep.subr.mxu1 %v3460_v3 }
 0x6fb   :  { %v867_v8 = vpop.f32.mrf.mxu1 }
 0x6fc   :  { %v871_v10 = vadd.f32 %v1759_v7, %v867_v8 }
 0x6fd   :  { %v2062_v11 = vpop.f32.mrf.mxu1 }
 0x6fe   :  { %2241 = vtanh.f32 %v871_v10  ;;  %v1764_v10 = vld [vmem:[%s3458_s0 + $0x68] sm:$0xff] }
 0x6ff   :  { %2243 = vrcp.f32 %v779_v9 }
 0x70b   :  { %v2242_v12 = vpop.eup %2241 }
 0x70c   :  { %v873_v13 = vsub.f32 %v2862_v24, %v2242_v12  ;;  %v2244_v14 = vpop.eup %2243  ;;  %v3168_v24 = vld [vmem:[%s3457_s2 + $0x40] sm:$0xff] }
 0x70d   :  { %2078 = vmatpush3.msra.mxu1 %v3168_v24 }
 0x70e   :  { %v874_v15 = vmul.f32 %v2244_v14, %v873_v13  ;;  %2079 = vmatprep.subr.mxu1 %v3460_v3 }
 0x70f   :  { %2080 = vmatpush3.msra.mxu1 %v3175_v34 }
 0x710   :  { %v3076_v16 = vadd.f32 %v2242_v12, %v874_v15  ;;  %2081 = vmatprep.subr.mxu1 %v3460_v3  ;;  %v1765_v15 = vld [vmem:[%s3458_s0 + $0x70] sm:$0xff] }
 0x711   :  { %2082 = vmatpush3.msra.mxu1 %v3182_v35 }
 0x712   :  { %1762 = vst [vmem:[%s3459_s3 + $0x18] sm:$0xff] %v3076_v16  ;;  %979 = vmatmul.mubr.f32.vlgmr.msra.gmra.mxu0 %v3076_v16  ;;  %2083 = vmatprep.subr.mxu1 %v3460_v3 }
 0x713   :  { %1130 = vmatpush1.msra.mxu0 %v2878_v26  ;;  %1193 = vmatprep.mubr.f32.mxu0 %v3460_v3 }
 0x714   :  { %1131 = vmatprep.subr.mxu0 %v2883_v27  ;;  %2084 = vmatpush3.msra.mxu1 %v3187_v36 }
 0x715   :  { %1132 = vmatpush1.msra.mxu0 %v2889_v28  ;;  %2085 = vmatprep.subr.mxu1 %v3460_v3 }
 0x716   :  { %1133 = vmatprep.subr.mxu0 %v2895_v29  ;;  %2086 = vmatpush3.msra.mxu1 %v3194_v37 }
 0x717   :  { %1134 = vmatpush1.msra.mxu0 %v2901_v30  ;;  %2087 = vmatprep.subr.mxu1 %v3460_v3 }
 0x718   :  { %1135 = vmatprep.subr.mxu0 %v2907_v31  ;;  %2088 = vmatpush3.msra.mxu1 %v3201_v38 }
 0x719   :  { %1136 = vmatpush1.msra.mxu0 %v2913_v32  ;;  %2089 = vmatprep.subr.mxu1 %v3460_v3 }
 0x71a   :  { %1137 = vmatprep.subr.mxu0 %v2919_v33  ;;  %2090 = vmatpush3.msra.mxu1 %v3208_v39 }
 0x71b   :  { %1138 = vmatpush1.msra.mxu0 %v2933_v42  ;;  %2091 = vmatprep.subr.mxu1 %v3460_v3 }
 0x71c   :  { %1139 = vmatprep.subr.mxu0 %v2939_v43  ;;  %2092 = vmatpush3.msra.mxu1 %v3215_v40 }
 0x71d   :  { %1140 = vmatpush1.msra.mxu0 %v2945_v44  ;;  %2093 = vmatprep.subr.mxu1 %v3460_v3 }
 0x71e   :  { %1141 = vmatprep.subr.mxu0 %v2951_v45  ;;  %2094 = vmatpush3.msra.mxu1 %v3222_v41 }
 0x71f   :  { %1142 = vmatpush1.msra.mxu0 %v2957_v46  ;;  %2098 = vmatprep.subr.mxu1 %v3460_v3 }
 0x720   :  { %1143 = vmatprep.subr.mxu0 %v2962_v47 }
 0x721   :  { %1144 = vmatpush1.msra.mxu0 %v2967_v48 }
 0x722   :  { %1145 = vmatprep.subr.mxu0 %v2973_v56 }
 0x723   :  { %1146 = vmatpush1.msra.mxu0 %v2979_v0 }
 0x724   :  { %1147 = vmatprep.subr.mxu0 %v2985_v50 }
 0x725   :  { %1148 = vmatpush1.msra.mxu0 %v2991_v51 }
 0x726   :  { %1149 = vmatprep.subr.mxu0 %v2997_v52 }
 0x727   :  { %1150 = vmatpush1.msra.mxu0 %v3003_v53 }
 0x728   :  { %1151 = vmatprep.subr.mxu0 %v3009_v54 }
 0x729   :  { %1152 = vmatpush1.msra.mxu0 %v3015_v55 }
 0x72a   :  { %1153 = vmatprep.subr.mxu0 %v3021_v57 }
 0x72b   :  { %1154 = vmatpush1.msra.mxu0 %v3027_v58 }
 0x72c   :  { %1155 = vmatprep.subr.mxu0 %v3033_v59 }
 0x72d   :  { %1156 = vmatpush1.msra.mxu0 %v3039_v60 }
 0x72e   :  { %1157 = vmatprep.subr.mxu0 %v3045_v61 }
 0x72f   :  { %1158 = vmatpush1.msra.mxu0 %v3051_v62 }
 0x730   :  { %1159 = vmatprep.subr.mxu0 %v3057_v63 }
 0x731   :  { %1160 = vmatpush1.msra.mxu0 %v3063_v49 }
 0x732   :  { %1344 = vmatprep.subr.mxu0 %v2873_v25 }
 0x7d2   :  { %v980_v2 = vpop.f32.mrf.mxu0 }
 0x7d3   :  { %v985_v4 = vadd.f32 %v1763_v1, %v980_v2 }
 0x7d4   :  { %v982_v11 = vpop.f32.mrf.mxu0 }
 0x7d5   :  { %v1766_v5 = vmul.f32 -1.442695, %v985_v4  ;;  %v986_v12 = vadd.f32 %v1764_v10, %v982_v11  ;;  %v3462_v10 = vmov 0.0  }
 0x7d7   :  { %2245 = vpow2.f32 %v1766_v5  ;;  %v1767_v13 = vmul.f32 -1.442695, %v986_v12 }
 0x7e4   :  { %v2246_v6 = vpop.eup %2245 }
 0x7e5   :  { %v993_v7 = vadd.f32 1.0, %v2246_v6 }
 0x7e7   :  { %2247 = vrcp.f32 %v993_v7 }
 0x7e8   :  { %2249 = vpow2.f32 %v1767_v13 }
 0x7f4   :  { %v2248_v8 = vpop.eup %2247 }
 0x7f5   :  { %v999_v9 = vmul.f32 %v2248_v8, %v3076_v16  ;;  %v2250_v14 = vpop.eup %2249 }
 0x7f6   :  { %v994_v2 = vadd.f32 1.0, %v2250_v14 }
 0x7f7   :  { %2096 = vmatmul.mubr.f32.vlgmr.msra.gmra.mxu1 %v999_v9 }
 0x7f8   :  { %2099 = vmatpush3.msra.mxu1 %v3119_v17  ;;  %2130 = vmatprep.mubr.msk.f32.mxu1 %vm2286_vm0, %v3460_v3 }
 0x7f9   :  { %2100 = vmatprep.subr.mxu1 %v3460_v3 }
 0x7fa   :  { %2101 = vmatpush3.msra.mxu1 %v3126_v18 }
 0x7fb   :  { %2102 = vmatprep.subr.mxu1 %v3460_v3 }
 0x7fc   :  { %2103 = vmatpush3.msra.mxu1 %v3133_v19 }
 0x7fd   :  { %2104 = vmatprep.subr.mxu1 %v3460_v3 }
 0x7fe   :  { %2105 = vmatpush3.msra.mxu1 %v3140_v20 }
 0x7ff   :  { %2106 = vmatprep.subr.mxu1 %v3460_v3 }
 0x800   :  { %2107 = vmatpush3.msra.mxu1 %v3147_v21 }
 0x801   :  { %2108 = vmatprep.subr.mxu1 %v3460_v3 }
 0x802   :  { %2109 = vmatpush3.msra.mxu1 %v3154_v22 }
 0x803   :  { %2110 = vmatprep.subr.mxu1 %v3460_v3 }
 0x804   :  { %2111 = vmatpush3.msra.mxu1 %v3161_v23 }
 0x805   :  { %2112 = vmatprep.subr.mxu1 %v3460_v3 }
 0x806   :  { %2113 = vmatpush3.msra.mxu1 %v3168_v24 }
 0x807   :  { %2114 = vmatprep.subr.mxu1 %v3460_v3 }
 0x808   :  { %2115 = vmatpush3.msra.mxu1 %v3175_v34 }
 0x809   :  { %2116 = vmatprep.subr.mxu1 %v3460_v3 }
 0x80a   :  { %2117 = vmatpush3.msra.mxu1 %v3182_v35 }
 0x80b   :  { %2118 = vmatprep.subr.mxu1 %v3460_v3 }
 0x80c   :  { %2119 = vmatpush3.msra.mxu1 %v3187_v36 }
 0x80d   :  { %2120 = vmatprep.subr.mxu1 %v3460_v3 }
 0x80e   :  { %2121 = vmatpush3.msra.mxu1 %v3194_v37 }
 0x80f   :  { %2122 = vmatprep.subr.mxu1 %v3460_v3 }
 0x810   :  { %2123 = vmatpush3.msra.mxu1 %v3201_v38 }
 0x811   :  { %2124 = vmatprep.subr.mxu1 %v3460_v3 }
 0x812   :  { %2125 = vmatpush3.msra.mxu1 %v3208_v39 }
 0x813   :  { %2126 = vmatprep.subr.mxu1 %v3460_v3 }
 0x814   :  { %2127 = vmatpush3.msra.mxu1 %v3215_v40 }
 0x815   :  { %2128 = vmatprep.subr.mxu1 %v3460_v3 }
 0x816   :  { %2129 = vmatpush3.msra.mxu1 %v3222_v41 }
 0x817   :  { %2133 = vmatprep.subr.mxu1 %v3460_v3 }
 0x8b7   :  { %v1082_v1 = vpop.f32.mrf.mxu1 }
 0x8b8   :  { %v1086_v4 = vadd.f32 %v1765_v15, %v1082_v1 }
 0x8b9   :  { %v2097_v5 = vpop.f32.mrf.mxu1 }
 0x8ba   :  { %2251 = vtanh.f32 %v1086_v4 }
 0x8bb   :  { %2253 = vrcp.f32 %v994_v2 }
 0x8c7   :  { %v2252_v6 = vpop.eup %2251 }
 0x8c8   :  { %v1088_v7 = vsub.f32 %v3076_v16, %v2252_v6  ;;  %v2254_v8 = vpop.eup %2253  ;;  %v1769_v16 = vld [vmem:[%s3458_s0 + $0x78] sm:$0xff] }
 0x8ca   :  { %v1089_v9 = vmul.f32 %v2254_v8, %v1088_v7  ;;  %v1771_v8 = vld [vmem:[%s3458_s0 + $0x88] sm:$0xff] }
 0x8cc   :  { %v3273_v3 = vadd.f32 %v2252_v6, %v1089_v9 }
 0x8ce   :  { %1768 = vst [vmem:[%s3459_s3 + $0x20] sm:$0xff] %v3273_v3  ;;  %1194 = vmatmul.mubr.f32.vlgmr.msra.gmra.mxu0 %v3273_v3 }
 0x8cf   :  { %1345 = vmatpush1.msra.mxu0 %v2878_v26  ;;  %1408 = vmatprep.mubr.f32.mxu0 %v3462_v10 }
 0x8d0   :  { %1346 = vmatprep.subr.mxu0 %v2883_v27 }
 0x8d1   :  { %1347 = vmatpush1.msra.mxu0 %v2889_v28 }
 0x8d2   :  { %1348 = vmatprep.subr.mxu0 %v2895_v29 }
 0x8d3   :  { %1349 = vmatpush1.msra.mxu0 %v2901_v30 }
 0x8d4   :  { %1350 = vmatprep.subr.mxu0 %v2907_v31 }
 0x8d5   :  { %1351 = vmatpush1.msra.mxu0 %v2913_v32 }
 0x8d6   :  { %1352 = vmatprep.subr.mxu0 %v2919_v33 }
 0x8d7   :  { %1353 = vmatpush1.msra.mxu0 %v2933_v42 }
 0x8d8   :  { %1354 = vmatprep.subr.mxu0 %v2939_v43 }
 0x8d9   :  { %1355 = vmatpush1.msra.mxu0 %v2945_v44 }
 0x8da   :  { %1356 = vmatprep.subr.mxu0 %v2951_v45 }
 0x8db   :  { %1357 = vmatpush1.msra.mxu0 %v2957_v46 }
 0x8dc   :  { %1358 = vmatprep.subr.mxu0 %v2962_v47 }
 0x8dd   :  { %1359 = vmatpush1.msra.mxu0 %v2967_v48 }
 0x8de   :  { %1360 = vmatprep.subr.mxu0 %v2973_v56 }
 0x8df   :  { %1361 = vmatpush1.msra.mxu0 %v2979_v0 }
 0x8e0   :  { %1362 = vmatprep.subr.mxu0 %v2985_v50 }
 0x8e1   :  { %1363 = vmatpush1.msra.mxu0 %v2991_v51 }
 0x8e2   :  { %1364 = vmatprep.subr.mxu0 %v2997_v52 }
 0x8e3   :  { %1365 = vmatpush1.msra.mxu0 %v3003_v53 }
 0x8e4   :  { %1366 = vmatprep.subr.mxu0 %v3009_v54 }
 0x8e5   :  { %1367 = vmatpush1.msra.mxu0 %v3015_v55 }
 0x8e6   :  { %1368 = vmatprep.subr.mxu0 %v3021_v57 }
 0x8e7   :  { %1369 = vmatpush1.msra.mxu0 %v3027_v58 }
 0x8e8   :  { %1370 = vmatprep.subr.mxu0 %v3033_v59 }
 0x8e9   :  { %1371 = vmatpush1.msra.mxu0 %v3039_v60 }
 0x8ea   :  { %1372 = vmatprep.subr.mxu0 %v3045_v61 }
 0x8eb   :  { %1373 = vmatpush1.msra.mxu0 %v3051_v62 }
 0x8ec   :  { %1374 = vmatprep.subr.mxu0 %v3057_v63 }
 0x8ed   :  { %1375 = vmatpush1.msra.mxu0 %v3063_v49 }
 0x8ee   :  { %1559 = vmatprep.subr.mxu0 %v2873_v25  ;;  %v1770_v25 = vld [vmem:[%s3458_s0 + $0x80] sm:$0xff] }
 0x98e   :  { %v1195_v11 = vpop.f32.mrf.mxu0 }
 0x98f   :  { %v1200_v12 = vadd.f32 %v1769_v16, %v1195_v11 }
 0x990   :  { %v1197_v4 = vpop.f32.mrf.mxu0 }
 0x991   :  { %v1772_v13 = vmul.f32 -1.442695, %v1200_v12  ;;  %v1201_v5 = vadd.f32 %v1770_v25, %v1197_v4 }
 0x993   :  { %2255 = vpow2.f32 %v1772_v13  ;;  %v1773_v6 = vmul.f32 -1.442695, %v1201_v5 }
 0x9a0   :  { %v2256_v14 = vpop.eup %2255 }
 0x9a1   :  { %v1208_v15 = vadd.f32 1.0, %v2256_v14 }
 0x9a3   :  { %2257 = vrcp.f32 %v1208_v15 }
 0x9a4   :  { %2259 = vpow2.f32 %v1773_v6 }
 0x9b0   :  { %v2258_v1 = vpop.eup %2257 }
 0x9b1   :  { %v1214_v2 = vmul.f32 %v2258_v1, %v3273_v3  ;;  %v2260_v7 = vpop.eup %2259 }
 0x9b2   :  { %v1209_v16 = vadd.f32 1.0, %v2260_v7 }
 0x9b3   :  { %2131 = vmatmul.mubr.f32.vlgmr.msra.gmra.mxu1 %v1214_v2 }
 0x9b4   :  { %2134 = vmatpush3.msra.mxu1 %v3119_v17  ;;  %2165 = vmatprep.mubr.msk.f32.mxu1 %vm2286_vm0, %v3462_v10 }
 0x9b5   :  { %2135 = vmatprep.subr.mxu1 %v3462_v10 }
 0x9b6   :  { %2136 = vmatpush3.msra.mxu1 %v3126_v18 }
 0x9b7   :  { %2137 = vmatprep.subr.mxu1 %v3462_v10 }
 0x9b8   :  { %2138 = vmatpush3.msra.mxu1 %v3133_v19 }
 0x9b9   :  { %2139 = vmatprep.subr.mxu1 %v3462_v10 }
 0x9ba   :  { %2140 = vmatpush3.msra.mxu1 %v3140_v20 }
 0x9bb   :  { %2141 = vmatprep.subr.mxu1 %v3462_v10 }
 0x9bc   :  { %2142 = vmatpush3.msra.mxu1 %v3147_v21 }
 0x9bd   :  { %2143 = vmatprep.subr.mxu1 %v3462_v10 }
 0x9be   :  { %2144 = vmatpush3.msra.mxu1 %v3154_v22 }
 0x9bf   :  { %2145 = vmatprep.subr.mxu1 %v3462_v10 }
 0x9c0   :  { %2146 = vmatpush3.msra.mxu1 %v3161_v23 }
 0x9c1   :  { %2147 = vmatprep.subr.mxu1 %v3462_v10 }
 0x9c2   :  { %2148 = vmatpush3.msra.mxu1 %v3168_v24 }
 0x9c3   :  { %2149 = vmatprep.subr.mxu1 %v3462_v10 }
 0x9c4   :  { %2150 = vmatpush3.msra.mxu1 %v3175_v34 }
 0x9c5   :  { %2151 = vmatprep.subr.mxu1 %v3462_v10 }
 0x9c6   :  { %2152 = vmatpush3.msra.mxu1 %v3182_v35 }
 0x9c7   :  { %2153 = vmatprep.subr.mxu1 %v3462_v10 }
 0x9c8   :  { %2154 = vmatpush3.msra.mxu1 %v3187_v36 }
 0x9c9   :  { %2155 = vmatprep.subr.mxu1 %v3462_v10 }
 0x9ca   :  { %2156 = vmatpush3.msra.mxu1 %v3194_v37 }
 0x9cb   :  { %2157 = vmatprep.subr.mxu1 %v3462_v10 }
 0x9cc   :  { %2158 = vmatpush3.msra.mxu1 %v3201_v38 }
 0x9cd   :  { %2159 = vmatprep.subr.mxu1 %v3462_v10 }
 0x9ce   :  { %2160 = vmatpush3.msra.mxu1 %v3208_v39 }
 0x9cf   :  { %2161 = vmatprep.subr.mxu1 %v3462_v10 }
 0x9d0   :  { %2162 = vmatpush3.msra.mxu1 %v3215_v40 }
 0x9d1   :  { %2163 = vmatprep.subr.mxu1 %v3462_v10 }
 0x9d2   :  { %2164 = vmatpush3.msra.mxu1 %v3222_v41 }
 0x9d3   :  { %2168 = vmatprep.subr.mxu1 %v3462_v10 }
 0xa73   :  { %v1297_v9 = vpop.f32.mrf.mxu1 }
 0xa74   :  { %v1301_v11 = vadd.f32 %v1771_v8, %v1297_v9 }
 0xa75   :  { %v2132_v12 = vpop.f32.mrf.mxu1 }
 0xa76   :  { %2261 = vtanh.f32 %v1301_v11 }
 0xa77   :  { %2263 = vrcp.f32 %v1209_v16 }
 0xa83   :  { %v2262_v13 = vpop.eup %2261 }
 0xa84   :  { %v1303_v14 = vsub.f32 %v3273_v3, %v2262_v13  ;;  %v2264_v15 = vpop.eup %2263  ;;  %v1775_v3 = vld [vmem:[%s3458_s0 + $0x90] sm:$0xff] }
 0xa86   :  { %v1304_v1 = vmul.f32 %v2264_v15, %v1303_v14 }
 0xa88   :  { %v3358_v2 = vadd.f32 %v2262_v13, %v1304_v1 }
 0xa8a   :  { %1774 = vst [vmem:[%s3459_s3 + $0x28] sm:$0xff] %v3358_v2  ;;  %1409 = vmatmul.mubr.f32.vlgmr.msra.gmra.mxu0 %v3358_v2 }
 0xa8b   :  { %1560 = vmatpush1.msra.mxu0 %v2878_v26  ;;  %1623 = vmatprep.mubr.f32.mxu0 %v3462_v10 }
 0xa8c   :  { %1561 = vmatprep.subr.mxu0 %v2883_v27 }
 0xa8d   :  { %1562 = vmatpush1.msra.mxu0 %v2889_v28 }
 0xa8e   :  { %1563 = vmatprep.subr.mxu0 %v2895_v29 }
 0xa8f   :  { %1564 = vmatpush1.msra.mxu0 %v2901_v30 }
 0xa90   :  { %1565 = vmatprep.subr.mxu0 %v2907_v31 }
 0xa91   :  { %1566 = vmatpush1.msra.mxu0 %v2913_v32 }
 0xa92   :  { %1567 = vmatprep.subr.mxu0 %v2919_v33  ;;  %v1776_v33 = vld [vmem:[%s3458_s0 + $0x98] sm:$0xff] }
 0xa93   :  { %1568 = vmatpush1.msra.mxu0 %v2933_v42 }
 0xa94   :  { %1569 = vmatprep.subr.mxu0 %v2939_v43 }
 0xa95   :  { %1570 = vmatpush1.msra.mxu0 %v2945_v44 }
 0xa96   :  { %1571 = vmatprep.subr.mxu0 %v2951_v45 }
 0xa97   :  { %1572 = vmatpush1.msra.mxu0 %v2957_v46  ;;  %v1777_v46 = vld [vmem:[%s3458_s0 + $0xa0] sm:$0xff] }
 0xa98   :  { %1573 = vmatprep.subr.mxu0 %v2962_v47 }
 0xa99   :  { %1574 = vmatpush1.msra.mxu0 %v2967_v48 }
 0xa9a   :  { %1575 = vmatprep.subr.mxu0 %v2973_v56 }
 0xa9b   :  { %1576 = vmatpush1.msra.mxu0 %v2979_v0 }
 0xa9c   :  { %1577 = vmatprep.subr.mxu0 %v2985_v50 }
 0xa9d   :  { %1578 = vmatpush1.msra.mxu0 %v2991_v51 }
 0xa9e   :  { %1579 = vmatprep.subr.mxu0 %v2997_v52 }
 0xa9f   :  { %1580 = vmatpush1.msra.mxu0 %v3003_v53 }
 0xaa0   :  { %1581 = vmatprep.subr.mxu0 %v3009_v54 }
 0xaa1   :  { %1582 = vmatpush1.msra.mxu0 %v3015_v55  ;;  %v1781_v55 = vld [vmem:[%s3458_s0 + $0xa8] sm:$0xff] }
 0xaa2   :  { %1583 = vmatprep.subr.mxu0 %v3021_v57 }
 0xaa3   :  { %1584 = vmatpush1.msra.mxu0 %v3027_v58 }
 0xaa4   :  { %1585 = vmatprep.subr.mxu0 %v3033_v59 }
 0xaa5   :  { %1586 = vmatpush1.msra.mxu0 %v3039_v60 }
 0xaa6   :  { %1587 = vmatprep.subr.mxu0 %v3045_v61 }
 0xaa7   :  { %1588 = vmatpush1.msra.mxu0 %v3051_v62 }
 0xaa8   :  { %1589 = vmatprep.subr.mxu0 %v3057_v63 }
 0xaa9   :  { %1590 = vmatpush1.msra.mxu0 %v3063_v49  ;;  %v1782_v49 = vld [vmem:[%s3458_s0 + $0xb0] sm:$0xff] }
 0xb4a   :  { %v1410_v26 = vpop.f32.mrf.mxu0 }
 0xb4b   :  { %v1415_v27 = vadd.f32 %v1775_v3, %v1410_v26 }
 0xb4c   :  { %v1412_v42 = vpop.f32.mrf.mxu0 }
 0xb4d   :  { %v1778_v28 = vmul.f32 -1.442695, %v1415_v27  ;;  %v1416_v43 = vadd.f32 %v1776_v33, %v1412_v42 }
 0xb4f   :  { %2265 = vpow2.f32 %v1778_v28  ;;  %v1779_v44 = vmul.f32 -1.442695, %v1416_v43 }
 0xb5c   :  { %v2266_v29 = vpop.eup %2265 }
 0xb5d   :  { %v1423_v30 = vadd.f32 1.0, %v2266_v29 }
 0xb5f   :  { %2267 = vrcp.f32 %v1423_v30 }
 0xb60   :  { %2269 = vpow2.f32 %v1779_v44 }
 0xb6c   :  { %v2268_v31 = vpop.eup %2267 }
 0xb6d   :  { %v1429_v32 = vmul.f32 %v2268_v31, %v3358_v2  ;;  %v2270_v45 = vpop.eup %2269 }
 0xb6e   :  { %v1424_v48 = vadd.f32 1.0, %v2270_v45 }
 0xb6f   :  { %2166 = vmatmul.mubr.f32.vlgmr.msra.gmra.mxu1 %v1429_v32 }
 0xb70   :  { %2169 = vmatpush3.msra.mxu1 %v3119_v17  ;;  %2200 = vmatprep.mubr.msk.f32.mxu1 %vm2286_vm0, %v3462_v10 }
 0xb71   :  { %2170 = vmatprep.subr.mxu1 %v3462_v10 }
 0xb72   :  { %2171 = vmatpush3.msra.mxu1 %v3126_v18 }
 0xb73   :  { %2172 = vmatprep.subr.mxu1 %v3462_v10 }
 0xb74   :  { %2173 = vmatpush3.msra.mxu1 %v3133_v19 }
 0xb75   :  { %2174 = vmatprep.subr.mxu1 %v3462_v10 }
 0xb76   :  { %2175 = vmatpush3.msra.mxu1 %v3140_v20 }
 0xb77   :  { %2176 = vmatprep.subr.mxu1 %v3462_v10 }
 0xb78   :  { %2177 = vmatpush3.msra.mxu1 %v3147_v21  ;;  %v1783_v21 = vld [vmem:[%s3458_s0 + $0xb8] sm:$0xff] }
 0xb79   :  { %2178 = vmatprep.subr.mxu1 %v3462_v10 }
 0xb7a   :  { %2179 = vmatpush3.msra.mxu1 %v3154_v22 }
 0xb7b   :  { %2180 = vmatprep.subr.mxu1 %v3462_v10 }
 0xb7c   :  { %2181 = vmatpush3.msra.mxu1 %v3161_v23 }
 0xb7d   :  { %2182 = vmatprep.subr.mxu1 %v3462_v10 }
 0xb7e   :  { %2183 = vmatpush3.msra.mxu1 %v3168_v24 }
 0xb7f   :  { %2184 = vmatprep.subr.mxu1 %v3462_v10 }
 0xb80   :  { %2185 = vmatpush3.msra.mxu1 %v3175_v34 }
 0xb81   :  { %2186 = vmatprep.subr.mxu1 %v3462_v10 }
 0xb82   :  { %2187 = vmatpush3.msra.mxu1 %v3182_v35 }
 0xb83   :  { %2188 = vmatprep.subr.mxu1 %v3462_v10 }
 0xb84   :  { %2189 = vmatpush3.msra.mxu1 %v3187_v36 }
 0xb85   :  { %2190 = vmatprep.subr.mxu1 %v3462_v10 }
 0xb86   :  { %2191 = vmatpush3.msra.mxu1 %v3194_v37 }
 0xb87   :  { %2192 = vmatprep.subr.mxu1 %v3462_v10 }
 0xb88   :  { %2193 = vmatpush3.msra.mxu1 %v3201_v38 }
 0xb89   :  { %2194 = vmatprep.subr.mxu1 %v3462_v10 }
 0xb8a   :  { %2195 = vmatpush3.msra.mxu1 %v3208_v39 }
 0xb8b   :  { %2196 = vmatprep.subr.mxu1 %v3462_v10 }
 0xb8c   :  { %2197 = vmatpush3.msra.mxu1 %v3215_v40 }
 0xb8d   :  { %2198 = vmatprep.subr.mxu1 %v3462_v10 }
 0xb8e   :  { %2199 = vmatpush3.msra.mxu1 %v3222_v41 }
 0xc2f   :  { %v1512_v47 = vpop.f32.mrf.mxu1 }
 0xc30   :  { %v1516_v56 = vadd.f32 %v1777_v46, %v1512_v47 }
 0xc31   :  { %v2167_v0 = vpop.f32.mrf.mxu1 }
 0xc32   :  { %2271 = vtanh.f32 %v1516_v56 }
 0xc33   :  { %2273 = vrcp.f32 %v1424_v48 }
 0xc3f   :  { %v2272_v50 = vpop.eup %2271 }
 0xc40   :  { %v1518_v51 = vsub.f32 %v3358_v2, %v2272_v50  ;;  %v2274_v52 = vpop.eup %2273 }
 0xc42   :  { %v1519_v53 = vmul.f32 %v2274_v52, %v1518_v51 }
 0xc44   :  { %v1520_v54 = vadd.f32 %v2272_v50, %v1519_v53 }
 0xc46   :  { %1780 = vst [vmem:[%s3459_s3 + $0x30] sm:$0xff] %v1520_v54  ;;  %1624 = vmatmul.mubr.f32.vlgmr.msra.gmra.mxu0 %v1520_v54 }
 0xd06   :  { %v1625_v57 = vpop.f32.mrf.mxu0 }
 0xd07   :  { %v1630_v58 = vadd.f32 %v1781_v55, %v1625_v57 }
 0xd08   :  { %v1627_v17 = vpop.f32.mrf.mxu0 }
 0xd09   :  { %v1784_v59 = vmul.f32 -1.442695, %v1630_v58  ;;  %v1631_v18 = vadd.f32 %v1782_v49, %v1627_v17 }
 0xd0b   :  { %2275 = vpow2.f32 %v1784_v59  ;;  %v1785_v19 = vmul.f32 -1.442695, %v1631_v18 }
 0xd18   :  { %v2276_v60 = vpop.eup %2275 }
 0xd19   :  { %v1638_v61 = vadd.f32 1.0, %v2276_v60 }
 0xd1b   :  { %2277 = vrcp.f32 %v1638_v61 }
 0xd1c   :  { %2279 = vpow2.f32 %v1785_v19 }
 0xd28   :  { %v2278_v62 = vpop.eup %2277 }
 0xd29   :  { %v1644_v63 = vmul.f32 %v2278_v62, %v1520_v54  ;;  %v2280_v20 = vpop.eup %2279 }
 0xd2a   :  { %v1639_v23 = vadd.f32 1.0, %v2280_v20 }
 0xd2b   :  { %2201 = vmatmul.mubr.f32.vlgmr.msra.gmra.mxu1 %v1644_v63 }
 0xdeb   :  { %v1727_v22 = vpop.f32.mrf.mxu1 }
 0xdec   :  { %v1731_v24 = vadd.f32 %v1783_v21, %v1727_v22 }
 0xded   :  { %v2202_v34 = vpop.f32.mrf.mxu1 }
 0xdee   :  { %2281 = vtanh.f32 %v1731_v24 }
 0xdef   :  { %2283 = vrcp.f32 %v1639_v23 }
 0xdfb   :  { %v2282_v35 = vpop.eup %2281 }
 0xdfc   :  { %v1733_v36 = vsub.f32 %v1520_v54, %v2282_v35  ;;  %v2284_v37 = vpop.eup %2283 }
 0xdfe   :  { %v1734_v38 = vmul.f32 %v2284_v37, %v1733_v36 }
 0xe00   :  { %v1735_v39 = vadd.f32 %v2282_v35, %v1734_v38 }
 0xe02   :  { %1786 = vst [vmem:[%s3459_s3 + $0x38] sm:$0xff] %v1735_v39 }

</bundles_post_ra>
